<compile_context>
chip_gen: v7x
topology: tpu7x:2x2x1
jax: 0.10.0
libtpu: 0.0.40
codegen_flags: <defaults>
</compile_context>

<pallas_src>
import math

import jax
import jax.numpy as jnp
from jax.experimental import pallas as pl
from jax.experimental.pallas import tpu as pltpu


# ----------------------------- kernel helpers -----------------------------

def _layer_norm(x, w, b, eps=1e-5):
    mu = jnp.mean(x, axis=-1, keepdims=True)
    var = jnp.mean(jnp.square(x - mu), axis=-1, keepdims=True)
    return (x - mu) * jax.lax.rsqrt(var + eps) * w + b


# --------------------------------- kernel ---------------------------------

def vit_kernel(xp_ref, convw_ref, pos_ref, maskb_ref, lnpre_w_ref, lnpre_b_ref,
               ln1_w_ref, ln1_b_ref, wq_ref, wk_ref, wv_ref,
               bq_ref, bk_ref, bv_ref, wo_ref, bo_ref,
               ln2_w_ref, ln2_b_ref, fc_w_ref, fc_b_ref, proj_w_ref, proj_b_ref,
               lnpost_w_ref, lnpost_b_ref,
               o_ref, x_scr):
    l = pl.program_id(1)
    n_layers = pl.num_programs(1)
    heads = wq_ref.shape[1]
    S, D = x_scr.shape
    bf16 = jnp.bfloat16

    # ---- layer 0 only: patch-embed (stride==kernel conv as a matmul) + pre-LN.
    # Row 0 of xp is zeros, and the class embedding is folded into pos row 0,
    # so row 0 of x equals class_embedding + pos[0] (conv1 has no bias).
    @pl.when(l == 0)
    def _():
        x0 = jnp.dot(xp_ref[0], convw_ref[...],
                     preferred_element_type=jnp.float32)          # (S, D)
        x0 = x0 + pos_ref[...]
        x_scr[...] = _layer_norm(x0, lnpre_w_ref[...], lnpre_b_ref[...])

    x = x_scr[...]                                                # (S, D) f32

    # ---------------- attention block (pre-LN, residual) ----------------
    xa = _layer_norm(x, ln1_w_ref[0], ln1_b_ref[0]).astype(bf16)  # (S, D)
    xh = jnp.broadcast_to(xa[None, :, :], (heads, S, D))          # (H, S, D)
    # Head-batched projections (full-D contraction).  Scale already folded in wq/bq.
    q = jnp.einsum('hsd,hdk->hsk', xh, wq_ref[0],
                   preferred_element_type=jnp.float32) + bq_ref[0]
    k = jnp.einsum('hsd,hdk->hsk', xh, wk_ref[0],
                   preferred_element_type=jnp.float32) + bk_ref[0]
    v = jnp.einsum('hsd,hdk->hsk', xh, wv_ref[0],
                   preferred_element_type=jnp.float32) + bv_ref[0]
    s = jnp.einsum('hqd,hkd->hqk', q.astype(bf16), k.astype(bf16),
                   preferred_element_type=jnp.float32)            # (H, S, S)
    s = s + maskb_ref[...]                                        # mask padded keys
    s = s - jnp.max(s, axis=-1, keepdims=True)
    e = jnp.exp(s)
    p = e * pl.reciprocal(jnp.sum(e, axis=-1, keepdims=True), approx=True)
    ctx = jnp.einsum('hqk,hkd->hqd', p.astype(bf16), v.astype(bf16),
                     preferred_element_type=jnp.float32)          # (H, S, hd)
    # Per-head output projection as one batched matmul + head reduction
    # (== concat(heads) @ W_out, no serial per-head accumulation chain).
    attn = jnp.einsum('hsk,hkd->hsd', ctx.astype(bf16), wo_ref[0],
                      preferred_element_type=jnp.float32)         # (H, S, D)
    x = x + jnp.sum(attn, axis=0) + bo_ref[0]

    # ------------------- MLP block (pre-LN, residual) --------------------
    xm = _layer_norm(x, ln2_w_ref[0], ln2_b_ref[0]).astype(bf16)
    h = jnp.dot(xm, fc_w_ref[0], preferred_element_type=jnp.float32) + fc_b_ref[0]
    h = (h * jax.nn.sigmoid(1.702 * h)).astype(bf16)              # QuickGELU (CLIP)
    x = x + jnp.dot(h, proj_w_ref[0], preferred_element_type=jnp.float32) + proj_b_ref[0]

    x_scr[...] = x

    # ---- last layer only: post-LN and store.
    @pl.when(l == n_layers - 1)
    def _():
        o_ref[0] = _layer_norm(x, lnpost_w_ref[...], lnpost_b_ref[...])


# -------------------------------- wrapper ---------------------------------

def vision_transformer_forward(x_nchw, kparams, *, patch_size, heads):
    B, C, Hi, Wi = x_nchw.shape
    p = patch_size
    gh, gw = Hi // p, Wi // p
    N = gh * gw
    P = C * p * p
    D = kparams["conv_w"].shape[1]
    S = N + 1
    S_pad = kparams["pos"].shape[0]
    L = kparams["ln1_w"].shape[0]
    assert kparams["wq"].shape[1] == heads

    # --- glue: extract non-overlapping patches, flatten in (C, kh, kw) order ---
    xp = x_nchw.astype(jnp.float32).reshape(B, C, gh, p, gw, p)
    xp = xp.transpose(0, 2, 4, 1, 3, 5).reshape(B, N, P)
    xp = jnp.concatenate(
        [jnp.zeros((B, 1, P), jnp.float32),          # class-token placeholder row
         xp,
         jnp.zeros((B, S_pad - S, P), jnp.float32)], # sequence padding rows
        axis=1).astype(jnp.bfloat16)                  # (B, S_pad, P)

    names = ["conv_w", "pos", "mask", "lnpre_w", "lnpre_b",
             "ln1_w", "ln1_b", "wq", "wk", "wv", "bq", "bk", "bv", "wo", "bo",
             "ln2_w", "ln2_b", "fc_w", "fc_b", "proj_w", "proj_b",
             "lnpost_w", "lnpost_b"]
    per_layer = {"ln1_w", "ln1_b", "wq", "wk", "wv", "bq", "bk", "bv", "wo", "bo",
                 "ln2_w", "ln2_b", "fc_w", "fc_b", "proj_w", "proj_b"}
    weights = [kparams[n] for n in names]

    def full_spec(arr):
        nd = arr.ndim
        return pl.BlockSpec(arr.shape, lambda b, l, _nd=nd: (0,) * _nd)

    def layer_spec(arr):
        nd = arr.ndim
        return pl.BlockSpec((1,) + tuple(arr.shape[1:]),
                            lambda b, l, _nd=nd: (l,) + (0,) * (_nd - 1))

    in_specs = [pl.BlockSpec((1, S_pad, P), lambda b, l: (b, 0, 0))]
    for n, w in zip(names, weights):
        in_specs.append(layer_spec(w) if n in per_layer else full_spec(w))

    grid_spec = pltpu.PrefetchScalarGridSpec(
        num_scalar_prefetch=0,
        grid=(B, L),
        in_specs=in_specs,
        out_specs=pl.BlockSpec((1, S_pad, D), lambda b, l: (b, 0, 0)),
        scratch_shapes=[pltpu.VMEM((S_pad, D), jnp.float32)],
    )

    out = pl.pallas_call(
        vit_kernel,
        out_shape=jax.ShapeDtypeStruct((B, S_pad, D), jnp.float32),
        grid_spec=grid_spec,
        compiler_params=pltpu.CompilerParams(
            dimension_semantics=("parallel", "arbitrary"),   # batch across TCs (v7x)
            vmem_limit_bytes=56 * 1024 * 1024),               # safe on v5e/v6e/v7x
    )(xp, *weights)
    return out[:, :S, :]


# ----------------------------- parameter init -----------------------------

def init_params(key, *, input_resolution, patch_size, width, layers, heads):
    """Create parameters in PyTorch (CLIP ViT) layout."""
    Hi, Wi = input_resolution
    gh = (Hi - patch_size) // patch_size + 1
    gw = (Wi - patch_size) // patch_size + 1
    S = gh * gw + 1
    D = width
    scale = D ** (-0.5)
    ks = jax.random.split(key, 12)
    return dict(
        conv1_weight=0.02 * jax.random.normal(ks[0], (D, 3, patch_size, patch_size), jnp.float32),
        class_embedding=scale * jax.random.normal(ks[1], (D,), jnp.float32),
        positional_embedding=scale * jax.random.normal(ks[2], (S, D), jnp.float32),
        ln_pre_weight=jnp.ones((D,), jnp.float32), ln_pre_bias=jnp.zeros((D,), jnp.float32),
        ln_post_weight=jnp.ones((D,), jnp.float32), ln_post_bias=jnp.zeros((D,), jnp.float32),
        ln_1_weight=jnp.ones((layers, D), jnp.float32), ln_1_bias=jnp.zeros((layers, D), jnp.float32),
        ln_2_weight=jnp.ones((layers, D), jnp.float32), ln_2_bias=jnp.zeros((layers, D), jnp.float32),
        in_proj_weight=0.02 * jax.random.normal(ks[3], (layers, 3 * D, D), jnp.float32),
        in_proj_bias=0.01 * jax.random.normal(ks[4], (layers, 3 * D), jnp.float32),
        out_proj_weight=0.02 * jax.random.normal(ks[5], (layers, D, D), jnp.float32),
        out_proj_bias=0.01 * jax.random.normal(ks[6], (layers, D), jnp.float32),
        c_fc_weight=0.02 * jax.random.normal(ks[7], (layers, 4 * D, D), jnp.float32),
        c_fc_bias=0.01 * jax.random.normal(ks[8], (layers, 4 * D), jnp.float32),
        c_proj_weight=0.02 * jax.random.normal(ks[9], (layers, D, 4 * D), jnp.float32),
        c_proj_bias=0.01 * jax.random.normal(ks[10], (layers, D), jnp.float32),
    )


def prepare_params(raw, *, heads, seq_pad):
    """One-time transform: PyTorch layout -> kernel layout (per-head stacked,
    scale folded into Q, bf16 matmul weights, padded positional embedding)."""
    D = raw["class_embedding"].shape[0]
    L = raw["in_proj_weight"].shape[0]
    hd = D // heads
    scale = 1.0 / math.sqrt(hd)
    S = raw["positional_embedding"].shape[0]
    bf = jnp.bfloat16

    def to_xw(w):                 # (L, out, in) -> (L, in, out)  for x @ W.T
        return jnp.transpose(w, (0, 2, 1))

    def cols_per_head(w):         # (L, D, D) -> (L, H, D, hd)  split output cols
        return w.reshape(L, D, heads, hd).transpose(0, 2, 1, 3)

    ipw = to_xw(raw["in_proj_weight"])     # (L, D, 3D), columns ordered [q | k | v]
    ipb = raw["in_proj_bias"]              # (L, 3D)

    pos = raw["positional_embedding"].at[0].add(raw["class_embedding"])
    pos = jnp.pad(pos, ((0, seq_pad - S), (0, 0)))

    return dict(
        conv_w=raw["conv1_weight"].reshape(D, -1).T.astype(bf),          # (P, D)
        pos=pos.astype(jnp.float32),                                     # (S_pad, D)
        mask=jnp.where(jnp.arange(seq_pad) < S, 0.0, -1e9).astype(jnp.float32)[None, :],
        lnpre_w=raw["ln_pre_weight"].reshape(1, D), lnpre_b=raw["ln_pre_bias"].reshape(1, D),
        ln1_w=raw["ln_1_weight"].reshape(L, 1, D), ln1_b=raw["ln_1_bias"].reshape(L, 1, D),
        wq=(cols_per_head(ipw[:, :, :D]) * scale).astype(bf),            # (L, H, D, hd)
        wk=cols_per_head(ipw[:, :, D:2 * D]).astype(bf),
        wv=cols_per_head(ipw[:, :, 2 * D:]).astype(bf),
        bq=(ipb[:, :D] * scale).reshape(L, heads, 1, hd).astype(jnp.float32),
        bk=ipb[:, D:2 * D].reshape(L, heads, 1, hd).astype(jnp.float32),
        bv=ipb[:, 2 * D:].reshape(L, heads, 1, hd).astype(jnp.float32),
        wo=to_xw(raw["out_proj_weight"]).reshape(L, heads, hd, D).astype(bf),
        bo=raw["out_proj_bias"].reshape(L, 1, D).astype(jnp.float32),
        ln2_w=raw["ln_2_weight"].reshape(L, 1, D), ln2_b=raw["ln_2_bias"].reshape(L, 1, D),
        fc_w=to_xw(raw["c_fc_weight"]).astype(bf),                       # (L, D, 4D)
        fc_b=raw["c_fc_bias"].reshape(L, 1, 4 * D).astype(jnp.float32),
        proj_w=to_xw(raw["c_proj_weight"]).astype(bf),                   # (L, 4D, D)
        proj_b=raw["c_proj_bias"].reshape(L, 1, D).astype(jnp.float32),
        lnpost_w=raw["ln_post_weight"].reshape(1, D), lnpost_b=raw["ln_post_bias"].reshape(1, D),
    )


# ---------------------------------- main -----------------------------------

if __name__ == "__main__":
    key = jax.random.PRNGKey(0)
    kx, kp = jax.random.split(key)

    input_resolution = (16, 16)
    patch_size = 8          # -> 2x2 grid, 5 tokens (padded to 8 inside)
    width = 32
    layers = 2
    heads = 4
    batch = 2

    S = (input_resolution[0] // patch_size) * (input_resolution[1] // patch_size) + 1
    S_pad = ((S + 7) // 8) * 8

    x = jax.random.normal(kx, (batch, 3, *input_resolution), jnp.float32)
    raw = init_params(kp, input_resolution=input_resolution, patch_size=patch_size,
                      width=width, layers=layers, heads=heads)
    kparams = prepare_params(raw, heads=heads, seq_pad=S_pad)

    out = vision_transformer_forward(x, kparams, patch_size=patch_size, heads=heads)
    jax.block_until_ready(out)
    assert out.shape == (batch, S, width)
    print("KERNEL_OK")
</pallas_src>

<mosaic_0001>
module attributes {stable_mosaic.version = 11 : i64} {
  func.func @vit_kernel(%arg0: i32, %arg1: i32, %arg2: memref<1x8x192xbf16, #tpu.memory_space<vmem>>, %arg3: memref<192x32xbf16, #tpu.memory_space<vmem>>, %arg4: memref<8x32xf32, #tpu.memory_space<vmem>>, %arg5: memref<1x8xf32, #tpu.memory_space<vmem>>, %arg6: memref<1x32xf32, #tpu.memory_space<vmem>>, %arg7: memref<1x32xf32, #tpu.memory_space<vmem>>, %arg8: memref<1x1x32xf32, #tpu.memory_space<vmem>>, %arg9: memref<1x1x32xf32, #tpu.memory_space<vmem>>, %arg10: memref<1x4x32x8xbf16, #tpu.memory_space<vmem>>, %arg11: memref<1x4x32x8xbf16, #tpu.memory_space<vmem>>, %arg12: memref<1x4x32x8xbf16, #tpu.memory_space<vmem>>, %arg13: memref<1x4x1x8xf32, #tpu.memory_space<vmem>>, %arg14: memref<1x4x1x8xf32, #tpu.memory_space<vmem>>, %arg15: memref<1x4x1x8xf32, #tpu.memory_space<vmem>>, %arg16: memref<1x4x8x32xbf16, #tpu.memory_space<vmem>>, %arg17: memref<1x1x32xf32, #tpu.memory_space<vmem>>, %arg18: memref<1x1x32xf32, #tpu.memory_space<vmem>>, %arg19: memref<1x1x32xf32, #tpu.memory_space<vmem>>, %arg20: memref<1x32x128xbf16, #tpu.memory_space<vmem>>, %arg21: memref<1x1x128xf32, #tpu.memory_space<vmem>>, %arg22: memref<1x128x32xbf16, #tpu.memory_space<vmem>>, %arg23: memref<1x1x32xf32, #tpu.memory_space<vmem>>, %arg24: memref<1x32xf32, #tpu.memory_space<vmem>>, %arg25: memref<1x32xf32, #tpu.memory_space<vmem>>, %arg26: memref<1x8x32xf32, #tpu.memory_space<vmem>>, %arg27: memref<8x32xf32, #tpu.memory_space<vmem>>) attributes {dimension_semantics = [#tpu.dimension_semantics<parallel>, #tpu.dimension_semantics<arbitrary>], iteration_bounds = array<i64: 2, 2>, scalar_prefetch = 0 : i64, scratch_operands = 1 : i64, tpu.core_type = #tpu.core_type<tc>, window_params = [{transform_indices = @transform_0, window_bounds = array<i64: 1, 8, 192>}, {pipeline_mode = #tpu.pipeline_mode<synchronous>, transform_indices = @transform_1, window_bounds = array<i64: 192, 32>}, {pipeline_mode = #tpu.pipeline_mode<synchronous>, transform_indices = @transform_2, window_bounds = array<i64: 8, 32>}, {pipeline_mode = #tpu.pipeline_mode<synchronous>, transform_indices = @transform_3, window_bounds = array<i64: 1, 8>}, {pipeline_mode = #tpu.pipeline_mode<synchronous>, transform_indices = @transform_4, window_bounds = array<i64: 1, 32>}, {pipeline_mode = #tpu.pipeline_mode<synchronous>, transform_indices = @transform_5, window_bounds = array<i64: 1, 32>}, {transform_indices = @transform_6, window_bounds = array<i64: 1, 1, 32>}, {transform_indices = @transform_7, window_bounds = array<i64: 1, 1, 32>}, {transform_indices = @transform_8, window_bounds = array<i64: 1, 4, 32, 8>}, {transform_indices = @transform_9, window_bounds = array<i64: 1, 4, 32, 8>}, {transform_indices = @transform_10, window_bounds = array<i64: 1, 4, 32, 8>}, {transform_indices = @transform_11, window_bounds = array<i64: 1, 4, 1, 8>}, {transform_indices = @transform_12, window_bounds = array<i64: 1, 4, 1, 8>}, {transform_indices = @transform_13, window_bounds = array<i64: 1, 4, 1, 8>}, {transform_indices = @transform_14, window_bounds = array<i64: 1, 4, 8, 32>}, {transform_indices = @transform_15, window_bounds = array<i64: 1, 1, 32>}, {transform_indices = @transform_16, window_bounds = array<i64: 1, 1, 32>}, {transform_indices = @transform_17, window_bounds = array<i64: 1, 1, 32>}, {transform_indices = @transform_18, window_bounds = array<i64: 1, 32, 128>}, {transform_indices = @transform_19, window_bounds = array<i64: 1, 1, 128>}, {transform_indices = @transform_20, window_bounds = array<i64: 1, 128, 32>}, {transform_indices = @transform_21, window_bounds = array<i64: 1, 1, 32>}, {pipeline_mode = #tpu.pipeline_mode<synchronous>, transform_indices = @transform_22, window_bounds = array<i64: 1, 32>}, {pipeline_mode = #tpu.pipeline_mode<synchronous>, transform_indices = @transform_23, window_bounds = array<i64: 1, 32>}, {transform_indices = @transform_24, window_bounds = array<i64: 1, 8, 32>}]} {
    %c0_i32 = arith.constant 0 : i32
    %0 = arith.cmpi eq, %arg1, %c0_i32 : i32
    %1 = arith.extui %0 : i1 to i32
    %c0_i32_0 = arith.constant 0 : i32
    %2 = arith.cmpi ne, %1, %c0_i32_0 : i32
    scf.if %2 {
      %c0_84 = arith.constant 0 : index
      %c0_85 = arith.constant 0 : index
      %c0_86 = arith.constant 0 : index
      %140 = vector.load %arg2[%c0_84, %c0_85, %c0_86] : memref<1x8x192xbf16, #tpu.memory_space<vmem>>, vector<1x8x192xbf16>
      %141 = vector.shape_cast %140 : vector<1x8x192xbf16> to vector<8x192xbf16>
      %c0_87 = arith.constant 0 : index
      %c0_88 = arith.constant 0 : index
      %142 = vector.load %arg3[%c0_87, %c0_88] : memref<192x32xbf16, #tpu.memory_space<vmem>>, vector<192x32xbf16>
      %cst_89 = arith.constant dense<0.000000e+00> : vector<8x32xf32>
      %143 = tpu.matmul %141, %142, %cst_89 {dimension_numbers = #tpu.dot_dimension_numbers<[1], [0], [0], [1], [0, 0, 1, 1], [], []>} : vector<8x192xbf16>, vector<192x32xbf16>, vector<8x32xf32> -> vector<8x32xf32>
      %c0_90 = arith.constant 0 : index
      %c0_91 = arith.constant 0 : index
      %144 = vector.load %arg4[%c0_90, %c0_91] : memref<8x32xf32, #tpu.memory_space<vmem>>, vector<8x32xf32>
      %145 = arith.addf %143, %144 : vector<8x32xf32>
      %c0_92 = arith.constant 0 : index
      %c0_93 = arith.constant 0 : index
      %146 = vector.load %arg6[%c0_92, %c0_93] : memref<1x32xf32, #tpu.memory_space<vmem>>, vector<1x32xf32>
      %c0_94 = arith.constant 0 : index
      %c0_95 = arith.constant 0 : index
      %147 = vector.load %arg7[%c0_94, %c0_95] : memref<1x32xf32, #tpu.memory_space<vmem>>, vector<1x32xf32>
      %cst_96 = arith.constant dense<0.000000e+00> : vector<8xf32>
      %148 = vector.multi_reduction <add>, %145, %cst_96 [1] : vector<8x32xf32> to vector<8xf32>
      %149 = vector.shape_cast %148 : vector<8xf32> to vector<8x1xf32>
      %cst_97 = arith.constant 3.200000e+01 : f32
      %150 = vector.broadcast %cst_97 : f32 to vector<8x1xf32>
      %151 = arith.divf %149, %150 : vector<8x1xf32>
      %152 = vector.broadcast %151 : vector<8x1xf32> to vector<8x32xf32>
      %153 = arith.subf %145, %152 : vector<8x32xf32>
      %154 = arith.mulf %153, %153 : vector<8x32xf32>
      %cst_98 = arith.constant dense<0.000000e+00> : vector<8xf32>
      %155 = vector.multi_reduction <add>, %154, %cst_98 [1] : vector<8x32xf32> to vector<8xf32>
      %156 = vector.shape_cast %155 : vector<8xf32> to vector<8x1xf32>
      %cst_99 = arith.constant 3.200000e+01 : f32
      %157 = vector.broadcast %cst_99 : f32 to vector<8x1xf32>
      %158 = arith.divf %156, %157 : vector<8x1xf32>
      %159 = vector.broadcast %151 : vector<8x1xf32> to vector<8x32xf32>
      %160 = arith.subf %145, %159 : vector<8x32xf32>
      %cst_100 = arith.constant 9.99999974E-6 : f32
      %161 = vector.broadcast %cst_100 : f32 to vector<8x1xf32>
      %162 = arith.addf %158, %161 : vector<8x1xf32>
      %163 = math.rsqrt %162 : vector<8x1xf32>
      %164 = vector.broadcast %163 : vector<8x1xf32> to vector<8x32xf32>
      %165 = arith.mulf %160, %164 : vector<8x32xf32>
      %166 = vector.broadcast %146 : vector<1x32xf32> to vector<8x32xf32>
      %167 = arith.mulf %165, %166 : vector<8x32xf32>
      %168 = vector.broadcast %147 : vector<1x32xf32> to vector<8x32xf32>
      %169 = arith.addf %167, %168 : vector<8x32xf32>
      %c0_101 = arith.constant 0 : index
      %c0_102 = arith.constant 0 : index
      %170 = vector.load %arg27[%c0_101, %c0_102] : memref<8x32xf32, #tpu.memory_space<vmem>>, vector<8x32xf32>
      tpu.vector_store %arg27[%c0_101, %c0_102], %169 {strides = array<i32>} : memref<8x32xf32, #tpu.memory_space<vmem>>, vector<8x32xf32>,
    } else {
    }
    %c0 = arith.constant 0 : index
    %c0_1 = arith.constant 0 : index
    %3 = vector.load %arg27[%c0, %c0_1] : memref<8x32xf32, #tpu.memory_space<vmem>>, vector<8x32xf32>
    %c0_2 = arith.constant 0 : index
    %c0_3 = arith.constant 0 : index
    %c0_4 = arith.constant 0 : index
    %4 = vector.load %arg8[%c0_2, %c0_3, %c0_4] : memref<1x1x32xf32, #tpu.memory_space<vmem>>, vector<1x1x32xf32>
    %5 = vector.shape_cast %4 : vector<1x1x32xf32> to vector<1x32xf32>
    %c0_5 = arith.constant 0 : index
    %c0_6 = arith.constant 0 : index
    %c0_7 = arith.constant 0 : index
    %6 = vector.load %arg9[%c0_5, %c0_6, %c0_7] : memref<1x1x32xf32, #tpu.memory_space<vmem>>, vector<1x1x32xf32>
    %7 = vector.shape_cast %6 : vector<1x1x32xf32> to vector<1x32xf32>
    %cst = arith.constant dense<0.000000e+00> : vector<8xf32>
    %8 = vector.multi_reduction <add>, %3, %cst [1] : vector<8x32xf32> to vector<8xf32>
    %9 = vector.shape_cast %8 : vector<8xf32> to vector<8x1xf32>
    %cst_8 = arith.constant 3.200000e+01 : f32
    %10 = vector.broadcast %cst_8 : f32 to vector<8x1xf32>
    %11 = arith.divf %9, %10 : vector<8x1xf32>
    %12 = vector.broadcast %11 : vector<8x1xf32> to vector<8x32xf32>
    %13 = arith.subf %3, %12 : vector<8x32xf32>
    %14 = arith.mulf %13, %13 : vector<8x32xf32>
    %cst_9 = arith.constant dense<0.000000e+00> : vector<8xf32>
    %15 = vector.multi_reduction <add>, %14, %cst_9 [1] : vector<8x32xf32> to vector<8xf32>
    %16 = vector.shape_cast %15 : vector<8xf32> to vector<8x1xf32>
    %cst_10 = arith.constant 3.200000e+01 : f32
    %17 = vector.broadcast %cst_10 : f32 to vector<8x1xf32>
    %18 = arith.divf %16, %17 : vector<8x1xf32>
    %19 = vector.broadcast %11 : vector<8x1xf32> to vector<8x32xf32>
    %20 = arith.subf %3, %19 : vector<8x32xf32>
    %cst_11 = arith.constant 9.99999974E-6 : f32
    %21 = vector.broadcast %cst_11 : f32 to vector<8x1xf32>
    %22 = arith.addf %18, %21 : vector<8x1xf32>
    %23 = math.rsqrt %22 : vector<8x1xf32>
    %24 = vector.broadcast %23 : vector<8x1xf32> to vector<8x32xf32>
    %25 = arith.mulf %20, %24 : vector<8x32xf32>
    %26 = vector.broadcast %5 : vector<1x32xf32> to vector<8x32xf32>
    %27 = arith.mulf %25, %26 : vector<8x32xf32>
    %28 = vector.broadcast %7 : vector<1x32xf32> to vector<8x32xf32>
    %29 = arith.addf %27, %28 : vector<8x32xf32>
    %30 = arith.truncf %29 : vector<8x32xf32> to vector<8x32xbf16>
    %31 = vector.shape_cast %30 : vector<8x32xbf16> to vector<1x8x32xbf16>
    %32 = vector.shape_cast %31 : vector<1x8x32xbf16> to vector<1x8x32xbf16>
    %33 = vector.broadcast %32 : vector<1x8x32xbf16> to vector<4x8x32xbf16>
    %c0_12 = arith.constant 0 : index
    %c0_13 = arith.constant 0 : index
    %c0_14 = arith.constant 0 : index
    %c0_15 = arith.constant 0 : index
    %34 = vector.load %arg10[%c0_12, %c0_13, %c0_14, %c0_15] : memref<1x4x32x8xbf16, #tpu.memory_space<vmem>>, vector<1x4x32x8xbf16>
    %35 = vector.shape_cast %34 : vector<1x4x32x8xbf16> to vector<4x32x8xbf16>
    "tpu.trace_start"() <{level = 10 : i32, message = "hsd,hdk->hsk"}> : () -> ()
    %cst_16 = arith.constant dense<0.000000e+00> : vector<4x8x8xf32>
    %36 = tpu.matmul %33, %35, %cst_16 {dimension_numbers = #tpu.dot_dimension_numbers<[2], [1], [1], [2], [0, 0, 0, 1, 1, 2], [0], [0]>} : vector<4x8x32xbf16>, vector<4x32x8xbf16>, vector<4x8x8xf32> -> vector<4x8x8xf32>
    "tpu.trace_stop"() : () -> ()
    %c0_17 = arith.constant 0 : index
    %c0_18 = arith.constant 0 : index
    %c0_19 = arith.constant 0 : index
    %c0_20 = arith.constant 0 : index
    %37 = vector.load %arg13[%c0_17, %c0_18, %c0_19, %c0_20] : memref<1x4x1x8xf32, #tpu.memory_space<vmem>>, vector<1x4x1x8xf32>
    %38 = vector.shape_cast %37 : vector<1x4x1x8xf32> to vector<4x1x8xf32>
    %39 = vector.broadcast %38 : vector<4x1x8xf32> to vector<4x8x8xf32>
    %40 = arith.addf %36, %39 : vector<4x8x8xf32>
    %c0_21 = arith.constant 0 : index
    %c0_22 = arith.constant 0 : index
    %c0_23 = arith.constant 0 : index
    %c0_24 = arith.constant 0 : index
    %41 = vector.load %arg11[%c0_21, %c0_22, %c0_23, %c0_24] : memref<1x4x32x8xbf16, #tpu.memory_space<vmem>>, vector<1x4x32x8xbf16>
    %42 = vector.shape_cast %41 : vector<1x4x32x8xbf16> to vector<4x32x8xbf16>
    "tpu.trace_start"() <{level = 10 : i32, message = "hsd,hdk->hsk"}> : () -> ()
    %cst_25 = arith.constant dense<0.000000e+00> : vector<4x8x8xf32>
    %43 = tpu.matmul %33, %42, %cst_25 {dimension_numbers = #tpu.dot_dimension_numbers<[2], [1], [1], [2], [0, 0, 0, 1, 1, 2], [0], [0]>} : vector<4x8x32xbf16>, vector<4x32x8xbf16>, vector<4x8x8xf32> -> vector<4x8x8xf32>
    "tpu.trace_stop"() : () -> ()
    %c0_26 = arith.constant 0 : index
    %c0_27 = arith.constant 0 : index
    %c0_28 = arith.constant 0 : index
    %c0_29 = arith.constant 0 : index
    %44 = vector.load %arg14[%c0_26, %c0_27, %c0_28, %c0_29] : memref<1x4x1x8xf32, #tpu.memory_space<vmem>>, vector<1x4x1x8xf32>
    %45 = vector.shape_cast %44 : vector<1x4x1x8xf32> to vector<4x1x8xf32>
    %46 = vector.broadcast %45 : vector<4x1x8xf32> to vector<4x8x8xf32>
    %47 = arith.addf %43, %46 : vector<4x8x8xf32>
    %c0_30 = arith.constant 0 : index
    %c0_31 = arith.constant 0 : index
    %c0_32 = arith.constant 0 : index
    %c0_33 = arith.constant 0 : index
    %48 = vector.load %arg12[%c0_30, %c0_31, %c0_32, %c0_33] : memref<1x4x32x8xbf16, #tpu.memory_space<vmem>>, vector<1x4x32x8xbf16>
    %49 = vector.shape_cast %48 : vector<1x4x32x8xbf16> to vector<4x32x8xbf16>
    "tpu.trace_start"() <{level = 10 : i32, message = "hsd,hdk->hsk"}> : () -> ()
    %cst_34 = arith.constant dense<0.000000e+00> : vector<4x8x8xf32>
    %50 = tpu.matmul %33, %49, %cst_34 {dimension_numbers = #tpu.dot_dimension_numbers<[2], [1], [1], [2], [0, 0, 0, 1, 1, 2], [0], [0]>} : vector<4x8x32xbf16>, vector<4x32x8xbf16>, vector<4x8x8xf32> -> vector<4x8x8xf32>
    "tpu.trace_stop"() : () -> ()
    %c0_35 = arith.constant 0 : index
    %c0_36 = arith.constant 0 : index
    %c0_37 = arith.constant 0 : index
    %c0_38 = arith.constant 0 : index
    %51 = vector.load %arg15[%c0_35, %c0_36, %c0_37, %c0_38] : memref<1x4x1x8xf32, #tpu.memory_space<vmem>>, vector<1x4x1x8xf32>
    %52 = vector.shape_cast %51 : vector<1x4x1x8xf32> to vector<4x1x8xf32>
    %53 = vector.broadcast %52 : vector<4x1x8xf32> to vector<4x8x8xf32>
    %54 = arith.addf %50, %53 : vector<4x8x8xf32>
    %55 = arith.truncf %40 : vector<4x8x8xf32> to vector<4x8x8xbf16>
    %56 = arith.truncf %47 : vector<4x8x8xf32> to vector<4x8x8xbf16>
    "tpu.trace_start"() <{level = 10 : i32, message = "hqd,hkd->hqk"}> : () -> ()
    %cst_39 = arith.constant dense<0.000000e+00> : vector<4x8x8xf32>
    %57 = tpu.matmul %55, %56, %cst_39 {dimension_numbers = #tpu.dot_dimension_numbers<[2], [2], [1], [1], [0, 0, 0, 1, 1, 1], [0], [0]>} : vector<4x8x8xbf16>, vector<4x8x8xbf16>, vector<4x8x8xf32> -> vector<4x8x8xf32>
    "tpu.trace_stop"() : () -> ()
    %c0_40 = arith.constant 0 : index
    %c0_41 = arith.constant 0 : index
    %58 = vector.load %arg5[%c0_40, %c0_41] : memref<1x8xf32, #tpu.memory_space<vmem>>, vector<1x8xf32>
    %59 = vector.shape_cast %58 : vector<1x8xf32> to vector<1x1x8xf32>
    %60 = vector.broadcast %59 : vector<1x1x8xf32> to vector<4x8x8xf32>
    %61 = arith.addf %57, %60 : vector<4x8x8xf32>
    %cst_42 = arith.constant dense<0xFF800000> : vector<4x8xf32>
    %62 = vector.multi_reduction <maximumf>, %61, %cst_42 [2] : vector<4x8x8xf32> to vector<4x8xf32>
    %63 = vector.shape_cast %62 : vector<4x8xf32> to vector<4x8x1xf32>
    %64 = vector.broadcast %63 : vector<4x8x1xf32> to vector<4x8x8xf32>
    %65 = arith.subf %61, %64 : vector<4x8x8xf32>
    %66 = math.exp %65 : vector<4x8x8xf32>
    %cst_43 = arith.constant dense<0.000000e+00> : vector<4x8xf32>
    %67 = vector.multi_reduction <add>, %66, %cst_43 [2] : vector<4x8x8xf32> to vector<4x8xf32>
    %68 = vector.shape_cast %67 : vector<4x8xf32> to vector<4x8x1xf32>
    %69 = tpu.reciprocal %68 {approx = true} : vector<4x8x1xf32> -> vector<4x8x1xf32>
    %70 = vector.broadcast %69 : vector<4x8x1xf32> to vector<4x8x8xf32>
    %71 = arith.mulf %66, %70 : vector<4x8x8xf32>
    %72 = arith.truncf %71 : vector<4x8x8xf32> to vector<4x8x8xbf16>
    %73 = arith.truncf %54 : vector<4x8x8xf32> to vector<4x8x8xbf16>
    "tpu.trace_start"() <{level = 10 : i32, message = "hqk,hkd->hqd"}> : () -> ()
    %cst_44 = arith.constant dense<0.000000e+00> : vector<4x8x8xf32>
    %74 = tpu.matmul %72, %73, %cst_44 {dimension_numbers = #tpu.dot_dimension_numbers<[2], [1], [1], [2], [0, 0, 0, 1, 1, 2], [0], [0]>} : vector<4x8x8xbf16>, vector<4x8x8xbf16>, vector<4x8x8xf32> -> vector<4x8x8xf32>
    "tpu.trace_stop"() : () -> ()
    %75 = arith.truncf %74 : vector<4x8x8xf32> to vector<4x8x8xbf16>
    %c0_45 = arith.constant 0 : index
    %c0_46 = arith.constant 0 : index
    %c0_47 = arith.constant 0 : index
    %c0_48 = arith.constant 0 : index
    %76 = vector.load %arg16[%c0_45, %c0_46, %c0_47, %c0_48] : memref<1x4x8x32xbf16, #tpu.memory_space<vmem>>, vector<1x4x8x32xbf16>
    %77 = vector.shape_cast %76 : vector<1x4x8x32xbf16> to vector<4x8x32xbf16>
    "tpu.trace_start"() <{level = 10 : i32, message = "hsk,hkd->hsd"}> : () -> ()
    %cst_49 = arith.constant dense<0.000000e+00> : vector<4x8x32xf32>
    %78 = tpu.matmul %75, %77, %cst_49 {dimension_numbers = #tpu.dot_dimension_numbers<[2], [1], [1], [2], [0, 0, 0, 1, 1, 2], [0], [0]>} : vector<4x8x8xbf16>, vector<4x8x32xbf16>, vector<4x8x32xf32> -> vector<4x8x32xf32>
    "tpu.trace_stop"() : () -> ()
    %cst_50 = arith.constant dense<0.000000e+00> : vector<8x32xf32>
    %79 = vector.multi_reduction <add>, %78, %cst_50 [0] : vector<4x8x32xf32> to vector<8x32xf32>
    %80 = arith.addf %3, %79 : vector<8x32xf32>
    %c0_51 = arith.constant 0 : index
    %c0_52 = arith.constant 0 : index
    %c0_53 = arith.constant 0 : index
    %81 = vector.load %arg17[%c0_51, %c0_52, %c0_53] : memref<1x1x32xf32, #tpu.memory_space<vmem>>, vector<1x1x32xf32>
    %82 = vector.shape_cast %81 : vector<1x1x32xf32> to vector<1x32xf32>
    %83 = vector.broadcast %82 : vector<1x32xf32> to vector<8x32xf32>
    %84 = arith.addf %80, %83 : vector<8x32xf32>
    %c0_54 = arith.constant 0 : index
    %c0_55 = arith.constant 0 : index
    %c0_56 = arith.constant 0 : index
    %85 = vector.load %arg18[%c0_54, %c0_55, %c0_56] : memref<1x1x32xf32, #tpu.memory_space<vmem>>, vector<1x1x32xf32>
    %86 = vector.shape_cast %85 : vector<1x1x32xf32> to vector<1x32xf32>
    %c0_57 = arith.constant 0 : index
    %c0_58 = arith.constant 0 : index
    %c0_59 = arith.constant 0 : index
    %87 = vector.load %arg19[%c0_57, %c0_58, %c0_59] : memref<1x1x32xf32, #tpu.memory_space<vmem>>, vector<1x1x32xf32>
    %88 = vector.shape_cast %87 : vector<1x1x32xf32> to vector<1x32xf32>
    %cst_60 = arith.constant dense<0.000000e+00> : vector<8xf32>
    %89 = vector.multi_reduction <add>, %84, %cst_60 [1] : vector<8x32xf32> to vector<8xf32>
    %90 = vector.shape_cast %89 : vector<8xf32> to vector<8x1xf32>
    %cst_61 = arith.constant 3.200000e+01 : f32
    %91 = vector.broadcast %cst_61 : f32 to vector<8x1xf32>
    %92 = arith.divf %90, %91 : vector<8x1xf32>
    %93 = vector.broadcast %92 : vector<8x1xf32> to vector<8x32xf32>
    %94 = arith.subf %84, %93 : vector<8x32xf32>
    %95 = arith.mulf %94, %94 : vector<8x32xf32>
    %cst_62 = arith.constant dense<0.000000e+00> : vector<8xf32>
    %96 = vector.multi_reduction <add>, %95, %cst_62 [1] : vector<8x32xf32> to vector<8xf32>
    %97 = vector.shape_cast %96 : vector<8xf32> to vector<8x1xf32>
    %cst_63 = arith.constant 3.200000e+01 : f32
    %98 = vector.broadcast %cst_63 : f32 to vector<8x1xf32>
    %99 = arith.divf %97, %98 : vector<8x1xf32>
    %100 = vector.broadcast %92 : vector<8x1xf32> to vector<8x32xf32>
    %101 = arith.subf %84, %100 : vector<8x32xf32>
    %cst_64 = arith.constant 9.99999974E-6 : f32
    %102 = vector.broadcast %cst_64 : f32 to vector<8x1xf32>
    %103 = arith.addf %99, %102 : vector<8x1xf32>
    %104 = math.rsqrt %103 : vector<8x1xf32>
    %105 = vector.broadcast %104 : vector<8x1xf32> to vector<8x32xf32>
    %106 = arith.mulf %101, %105 : vector<8x32xf32>
    %107 = vector.broadcast %86 : vector<1x32xf32> to vector<8x32xf32>
    %108 = arith.mulf %106, %107 : vector<8x32xf32>
    %109 = vector.broadcast %88 : vector<1x32xf32> to vector<8x32xf32>
    %110 = arith.addf %108, %109 : vector<8x32xf32>
    %111 = arith.truncf %110 : vector<8x32xf32> to vector<8x32xbf16>
    %c0_65 = arith.constant 0 : index
    %c0_66 = arith.constant 0 : index
    %c0_67 = arith.constant 0 : index
    %112 = vector.load %arg20[%c0_65, %c0_66, %c0_67] : memref<1x32x128xbf16, #tpu.memory_space<vmem>>, vector<1x32x128xbf16>
    %113 = vector.shape_cast %112 : vector<1x32x128xbf16> to vector<32x128xbf16>
    %cst_68 = arith.constant dense<0.000000e+00> : vector<8x128xf32>
    %114 = tpu.matmul %111, %113, %cst_68 {dimension_numbers = #tpu.dot_dimension_numbers<[1], [0], [0], [1], [0, 0, 1, 1], [], []>} : vector<8x32xbf16>, vector<32x128xbf16>, vector<8x128xf32> -> vector<8x128xf32>
    %c0_69 = arith.constant 0 : index
    %c0_70 = arith.constant 0 : index
    %c0_71 = arith.constant 0 : index
    %115 = vector.load %arg21[%c0_69, %c0_70, %c0_71] : memref<1x1x128xf32, #tpu.memory_space<vmem>>, vector<1x1x128xf32>
    %116 = vector.shape_cast %115 : vector<1x1x128xf32> to vector<1x128xf32>
    %117 = vector.broadcast %116 : vector<1x128xf32> to vector<8x128xf32>
    %118 = arith.addf %114, %117 : vector<8x128xf32>
    %cst_72 = arith.constant 1.702000e+00 : f32
    %119 = vector.broadcast %cst_72 : f32 to vector<8x128xf32>
    %120 = arith.mulf %119, %118 : vector<8x128xf32>
    %121 = arith.negf %120 : vector<8x128xf32>
    %122 = math.exp %121 : vector<8x128xf32>
    %cst_73 = arith.constant 1.000000e+00 : f32
    %123 = vector.broadcast %cst_73 : f32 to vector<8x128xf32>
    %124 = arith.addf %123, %122 : vector<8x128xf32>
    %125 = arith.divf %123, %124 : vector<8x128xf32>
    %126 = arith.mulf %118, %125 : vector<8x128xf32>
    %127 = arith.truncf %126 : vector<8x128xf32> to vector<8x128xbf16>
    %c0_74 = arith.constant 0 : index
    %c0_75 = arith.constant 0 : index
    %c0_76 = arith.constant 0 : index
    %128 = vector.load %arg22[%c0_74, %c0_75, %c0_76] : memref<1x128x32xbf16, #tpu.memory_space<vmem>>, vector<1x128x32xbf16>
    %129 = vector.shape_cast %128 : vector<1x128x32xbf16> to vector<128x32xbf16>
    %cst_77 = arith.constant dense<0.000000e+00> : vector<8x32xf32>
    %130 = tpu.matmul %127, %129, %cst_77 {dimension_numbers = #tpu.dot_dimension_numbers<[1], [0], [0], [1], [0, 0, 1, 1], [], []>} : vector<8x128xbf16>, vector<128x32xbf16>, vector<8x32xf32> -> vector<8x32xf32>
    %131 = arith.addf %84, %130 : vector<8x32xf32>
    %c0_78 = arith.constant 0 : index
    %c0_79 = arith.constant 0 : index
    %c0_80 = arith.constant 0 : index
    %132 = vector.load %arg23[%c0_78, %c0_79, %c0_80] : memref<1x1x32xf32, #tpu.memory_space<vmem>>, vector<1x1x32xf32>
    %133 = vector.shape_cast %132 : vector<1x1x32xf32> to vector<1x32xf32>
    %134 = vector.broadcast %133 : vector<1x32xf32> to vector<8x32xf32>
    %135 = arith.addf %131, %134 : vector<8x32xf32>
    %c0_81 = arith.constant 0 : index
    %c0_82 = arith.constant 0 : index
    %136 = vector.load %arg27[%c0_81, %c0_82] : memref<8x32xf32, #tpu.memory_space<vmem>>, vector<8x32xf32>
    tpu.vector_store %arg27[%c0_81, %c0_82], %135 {strides = array<i32>} : memref<8x32xf32, #tpu.memory_space<vmem>>, vector<8x32xf32>,
    %c1_i32 = arith.constant 1 : i32
    %137 = arith.cmpi eq, %arg1, %c1_i32 : i32
    %138 = arith.extui %137 : i1 to i32
    %c0_i32_83 = arith.constant 0 : i32
    %139 = arith.cmpi ne, %138, %c0_i32_83 : i32
    scf.if %139 {
      %c0_84 = arith.constant 0 : index
      %c0_85 = arith.constant 0 : index
      %140 = vector.load %arg24[%c0_84, %c0_85] : memref<1x32xf32, #tpu.memory_space<vmem>>, vector<1x32xf32>
      %c0_86 = arith.constant 0 : index
      %c0_87 = arith.constant 0 : index
      %141 = vector.load %arg25[%c0_86, %c0_87] : memref<1x32xf32, #tpu.memory_space<vmem>>, vector<1x32xf32>
      %cst_88 = arith.constant dense<0.000000e+00> : vector<8xf32>
      %142 = vector.multi_reduction <add>, %135, %cst_88 [1] : vector<8x32xf32> to vector<8xf32>
      %143 = vector.shape_cast %142 : vector<8xf32> to vector<8x1xf32>
      %cst_89 = arith.constant 3.200000e+01 : f32
      %144 = vector.broadcast %cst_89 : f32 to vector<8x1xf32>
      %145 = arith.divf %143, %144 : vector<8x1xf32>
      %146 = vector.broadcast %145 : vector<8x1xf32> to vector<8x32xf32>
      %147 = arith.subf %135, %146 : vector<8x32xf32>
      %148 = arith.mulf %147, %147 : vector<8x32xf32>
      %cst_90 = arith.constant dense<0.000000e+00> : vector<8xf32>
      %149 = vector.multi_reduction <add>, %148, %cst_90 [1] : vector<8x32xf32> to vector<8xf32>
      %150 = vector.shape_cast %149 : vector<8xf32> to vector<8x1xf32>
      %cst_91 = arith.constant 3.200000e+01 : f32
      %151 = vector.broadcast %cst_91 : f32 to vector<8x1xf32>
      %152 = arith.divf %150, %151 : vector<8x1xf32>
      %153 = vector.broadcast %145 : vector<8x1xf32> to vector<8x32xf32>
      %154 = arith.subf %135, %153 : vector<8x32xf32>
      %cst_92 = arith.constant 9.99999974E-6 : f32
      %155 = vector.broadcast %cst_92 : f32 to vector<8x1xf32>
      %156 = arith.addf %152, %155 : vector<8x1xf32>
      %157 = math.rsqrt %156 : vector<8x1xf32>
      %158 = vector.broadcast %157 : vector<8x1xf32> to vector<8x32xf32>
      %159 = arith.mulf %154, %158 : vector<8x32xf32>
      %160 = vector.broadcast %140 : vector<1x32xf32> to vector<8x32xf32>
      %161 = arith.mulf %159, %160 : vector<8x32xf32>
      %162 = vector.broadcast %141 : vector<1x32xf32> to vector<8x32xf32>
      %163 = arith.addf %161, %162 : vector<8x32xf32>
      %c0_93 = arith.constant 0 : index
      %c0_94 = arith.constant 0 : index
      %c0_95 = arith.constant 0 : index
      %164 = vector.load %arg26[%c0_93, %c0_94, %c0_95] : memref<1x8x32xf32, #tpu.memory_space<vmem>>, vector<1x8x32xf32>
      %165 = vector.shape_cast %164 : vector<1x8x32xf32> to vector<8x32xf32>
      %166 = vector.shape_cast %163 : vector<8x32xf32> to vector<1x8x32xf32>
      tpu.vector_store %arg26[%c0_93, %c0_94, %c0_95], %166 {strides = array<i32>} : memref<1x8x32xf32, #tpu.memory_space<vmem>>, vector<1x8x32xf32>,
    } else {
    }
    return
  }
  func.func @transform_0(%arg0: i32, %arg1: i32) -> (i32, i32, i32) {
    %c0_i32 = arith.constant 0 : i32
    %c0_i32_0 = arith.constant 0 : i32
    %c0_i32_1 = arith.constant 0 : i32
    return %arg0, %c0_i32, %c0_i32_0 : i32, i32, i32
  }
  func.func @transform_1(%arg0: i32, %arg1: i32) -> (i32, i32) {
    %c0_i32 = arith.constant 0 : i32
    %c0_i32_0 = arith.constant 0 : i32
    %c0_i32_1 = arith.constant 0 : i32
    return %c0_i32, %c0_i32_0 : i32, i32
  }
  func.func @transform_2(%arg0: i32, %arg1: i32) -> (i32, i32) {
    %c0_i32 = arith.constant 0 : i32
    %c0_i32_0 = arith.constant 0 : i32
    %c0_i32_1 = arith.constant 0 : i32
    return %c0_i32, %c0_i32_0 : i32, i32
  }
  func.func @transform_3(%arg0: i32, %arg1: i32) -> (i32, i32) {
    %c0_i32 = arith.constant 0 : i32
    %c0_i32_0 = arith.constant 0 : i32
    %c0_i32_1 = arith.constant 0 : i32
    return %c0_i32, %c0_i32_0 : i32, i32
  }
  func.func @transform_4(%arg0: i32, %arg1: i32) -> (i32, i32) {
    %c0_i32 = arith.constant 0 : i32
    %c0_i32_0 = arith.constant 0 : i32
    %c0_i32_1 = arith.constant 0 : i32
    return %c0_i32, %c0_i32_0 : i32, i32
  }
  func.func @transform_5(%arg0: i32, %arg1: i32) -> (i32, i32) {
    %c0_i32 = arith.constant 0 : i32
    %c0_i32_0 = arith.constant 0 : i32
    %c0_i32_1 = arith.constant 0 : i32
    return %c0_i32, %c0_i32_0 : i32, i32
  }
  func.func @transform_6(%arg0: i32, %arg1: i32) -> (i32, i32, i32) {
    %c0_i32 = arith.constant 0 : i32
    %c0_i32_0 = arith.constant 0 : i32
    %c0_i32_1 = arith.constant 0 : i32
    return %arg1, %c0_i32, %c0_i32_0 : i32, i32, i32
  }
  func.func @transform_7(%arg0: i32, %arg1: i32) -> (i32, i32, i32) {
    %c0_i32 = arith.constant 0 : i32
    %c0_i32_0 = arith.constant 0 : i32
    %c0_i32_1 = arith.constant 0 : i32
    return %arg1, %c0_i32, %c0_i32_0 : i32, i32, i32
  }
  func.func @transform_8(%arg0: i32, %arg1: i32) -> (i32, i32, i32, i32) {
    %c0_i32 = arith.constant 0 : i32
    %c0_i32_0 = arith.constant 0 : i32
    %c0_i32_1 = arith.constant 0 : i32
    %c0_i32_2 = arith.constant 0 : i32
    return %arg1, %c0_i32, %c0_i32_0, %c0_i32_1 : i32, i32, i32, i32
  }
  func.func @transform_9(%arg0: i32, %arg1: i32) -> (i32, i32, i32, i32) {
    %c0_i32 = arith.constant 0 : i32
    %c0_i32_0 = arith.constant 0 : i32
    %c0_i32_1 = arith.constant 0 : i32
    %c0_i32_2 = arith.constant 0 : i32
    return %arg1, %c0_i32, %c0_i32_0, %c0_i32_1 : i32, i32, i32, i32
  }
  func.func @transform_10(%arg0: i32, %arg1: i32) -> (i32, i32, i32, i32) {
    %c0_i32 = arith.constant 0 : i32
    %c0_i32_0 = arith.constant 0 : i32
    %c0_i32_1 = arith.constant 0 : i32
    %c0_i32_2 = arith.constant 0 : i32
    return %arg1, %c0_i32, %c0_i32_0, %c0_i32_1 : i32, i32, i32, i32
  }
  func.func @transform_11(%arg0: i32, %arg1: i32) -> (i32, i32, i32, i32) {
    %c0_i32 = arith.constant 0 : i32
    %c0_i32_0 = arith.constant 0 : i32
    %c0_i32_1 = arith.constant 0 : i32
    %c0_i32_2 = arith.constant 0 : i32
    return %arg1, %c0_i32, %c0_i32_0, %c0_i32_1 : i32, i32, i32, i32
  }
  func.func @transform_12(%arg0: i32, %arg1: i32) -> (i32, i32, i32, i32) {
    %c0_i32 = arith.constant 0 : i32
    %c0_i32_0 = arith.constant 0 : i32
    %c0_i32_1 = arith.constant 0 : i32
    %c0_i32_2 = arith.constant 0 : i32
    return %arg1, %c0_i32, %c0_i32_0, %c0_i32_1 : i32, i32, i32, i32
  }
  func.func @transform_13(%arg0: i32, %arg1: i32) -> (i32, i32, i32, i32) {
    %c0_i32 = arith.constant 0 : i32
    %c0_i32_0 = arith.constant 0 : i32
    %c0_i32_1 = arith.constant 0 : i32
    %c0_i32_2 = arith.constant 0 : i32
    return %arg1, %c0_i32, %c0_i32_0, %c0_i32_1 : i32, i32, i32, i32
  }
  func.func @transform_14(%arg0: i32, %arg1: i32) -> (i32, i32, i32, i32) {
    %c0_i32 = arith.constant 0 : i32
    %c0_i32_0 = arith.constant 0 : i32
    %c0_i32_1 = arith.constant 0 : i32
    %c0_i32_2 = arith.constant 0 : i32
    return %arg1, %c0_i32, %c0_i32_0, %c0_i32_1 : i32, i32, i32, i32
  }
  func.func @transform_15(%arg0: i32, %arg1: i32) -> (i32, i32, i32) {
    %c0_i32 = arith.constant 0 : i32
    %c0_i32_0 = arith.constant 0 : i32
    %c0_i32_1 = arith.constant 0 : i32
    return %arg1, %c0_i32, %c0_i32_0 : i32, i32, i32
  }
  func.func @transform_16(%arg0: i32, %arg1: i32) -> (i32, i32, i32) {
    %c0_i32 = arith.constant 0 : i32
    %c0_i32_0 = arith.constant 0 : i32
    %c0_i32_1 = arith.constant 0 : i32
    return %arg1, %c0_i32, %c0_i32_0 : i32, i32, i32
  }
  func.func @transform_17(%arg0: i32, %arg1: i32) -> (i32, i32, i32) {
    %c0_i32 = arith.constant 0 : i32
    %c0_i32_0 = arith.constant 0 : i32
    %c0_i32_1 = arith.constant 0 : i32
    return %arg1, %c0_i32, %c0_i32_0 : i32, i32, i32
  }
  func.func @transform_18(%arg0: i32, %arg1: i32) -> (i32, i32, i32) {
    %c0_i32 = arith.constant 0 : i32
    %c0_i32_0 = arith.constant 0 : i32
    %c0_i32_1 = arith.constant 0 : i32
    return %arg1, %c0_i32, %c0_i32_0 : i32, i32, i32
  }
  func.func @transform_19(%arg0: i32, %arg1: i32) -> (i32, i32, i32) {
    %c0_i32 = arith.constant 0 : i32
    %c0_i32_0 = arith.constant 0 : i32
    %c0_i32_1 = arith.constant 0 : i32
    return %arg1, %c0_i32, %c0_i32_0 : i32, i32, i32
  }
  func.func @transform_20(%arg0: i32, %arg1: i32) -> (i32, i32, i32) {
    %c0_i32 = arith.constant 0 : i32
    %c0_i32_0 = arith.constant 0 : i32
    %c0_i32_1 = arith.constant 0 : i32
    return %arg1, %c0_i32, %c0_i32_0 : i32, i32, i32
  }
  func.func @transform_21(%arg0: i32, %arg1: i32) -> (i32, i32, i32) {
    %c0_i32 = arith.constant 0 : i32
    %c0_i32_0 = arith.constant 0 : i32
    %c0_i32_1 = arith.constant 0 : i32
    return %arg1, %c0_i32, %c0_i32_0 : i32, i32, i32
  }
  func.func @transform_22(%arg0: i32, %arg1: i32) -> (i32, i32) {
    %c0_i32 = arith.constant 0 : i32
    %c0_i32_0 = arith.constant 0 : i32
    %c0_i32_1 = arith.constant 0 : i32
    return %c0_i32, %c0_i32_0 : i32, i32
  }
  func.func @transform_23(%arg0: i32, %arg1: i32) -> (i32, i32) {
    %c0_i32 = arith.constant 0 : i32
    %c0_i32_0 = arith.constant 0 : i32
    %c0_i32_1 = arith.constant 0 : i32
    return %c0_i32, %c0_i32_0 : i32, i32
  }
  func.func @transform_24(%arg0: i32, %arg1: i32) -> (i32, i32, i32) {
    %c0_i32 = arith.constant 0 : i32
    %c0_i32_0 = arith.constant 0 : i32
    %c0_i32_1 = arith.constant 0 : i32
    return %arg0, %c0_i32, %c0_i32_0 : i32, i32, i32
  }
}

</mosaic_0001>

<bundles_post_ra>
// kernel: tpu_custom_call.1
= control target key start
LH: loop header
LB: loop body
LE: loop exit
PB: predicated region body
PF: predicated region fallthrough
CT: control target
= control target key end

     0   :  { %s4477_s0 = inlined_call_operand.vmem [shape: bf16[2,8,192], index: 0, kind: input, shape index: {}]   ;;  %s4478_s1 = inlined_call_operand.vmem [shape: bf16[192,32], index: 1, kind: input, shape index: {}]   ;;  %s4479_s2 = inlined_call_operand.vmem [shape: f32[8,32], index: 2, kind: input, shape index: {}]   ;;  %s4480_s3 = inlined_call_operand.vmem [shape: f32[1,8], index: 3, kind: input, shape index: {}]   ;;  %s4481_s4 = inlined_call_operand.vmem [shape: f32[1,32], index: 4, kind: input, shape index: {}]   ;;  %s4482_s5 = inlined_call_operand.vmem [shape: f32[1,32], index: 5, kind: input, shape index: {}]   ;;  %s4483_s6 = inlined_call_operand.vmem [shape: f32[2,1,32], index: 6, kind: input, shape index: {}]   ;;  %s4484_s7 = inlined_call_operand.vmem [shape: f32[2,1,32], index: 7, kind: input, shape index: {}]   ;;  %s4485_s8 = inlined_call_operand.vmem [shape: bf16[2,4,32,8], index: 8, kind: input, shape index: {}]   ;;  %s4486_s9 = inlined_call_operand.vmem [shape: bf16[2,4,32,8], index: 9, kind: input, shape index: {}]   ;;  %s4487_s10 = inlined_call_operand.vmem [shape: bf16[2,4,32,8], index: 10, kind: input, shape index: {}]   ;;  %s4488_s11 = inlined_call_operand.vmem [shape: f32[2,4,1,8], index: 11, kind: input, shape index: {}]   ;;  %s4489_s12 = inlined_call_operand.vmem [shape: f32[2,4,1,8], index: 12, kind: input, shape index: {}]   ;;  %s4490_s13 = inlined_call_operand.vmem [shape: f32[2,4,1,8], index: 13, kind: input, shape index: {}]   ;;  %s4491_s14 = inlined_call_operand.vmem [shape: bf16[2,4,8,32], index: 14, kind: input, shape index: {}]   ;;  %s4492_s15 = inlined_call_operand.vmem [shape: f32[2,1,32], index: 15, kind: input, shape index: {}]   ;;  %s4493_s16 = inlined_call_operand.vmem [shape: f32[2,1,32], index: 16, kind: input, shape index: {}]   ;;  %s4494_s17 = inlined_call_operand.vmem [shape: f32[2,1,32], index: 17, kind: input, shape index: {}]   ;;  %s4495_s18 = inlined_call_operand.vmem [shape: bf16[2,32,128], index: 18, kind: input, shape index: {}]   ;;  %s4496_s19 = inlined_call_operand.vmem [shape: f32[2,1,128], index: 19, kind: input, shape index: {}]   ;;  %s4497_s20 = inlined_call_operand.vmem [shape: bf16[2,128,32], index: 20, kind: input, shape index: {}]   ;;  %s4498_s21 = inlined_call_operand.vmem [shape: f32[2,1,32], index: 21, kind: input, shape index: {}]   ;;  %s4499_s22 = inlined_call_operand.vmem [shape: f32[1,32], index: 22, kind: input, shape index: {}]   ;;  %s4500_s23 = inlined_call_operand.vmem [shape: f32[1,32], index: 23, kind: input, shape index: {}]   ;;  %s4501_s24 = inlined_call_operand.hbm [shape: f32[2,8,32], index: 24, kind: output, shape index: {}]  }
   0x1   :  { %4520 = sst [smem:[#allocation21_spill]] %s4477_s0 }
   0x2   :  { %4521 = sst [smem:[#allocation22_spill]] %s4478_s1 }
   0x3   :  { %4522 = sst [smem:[#allocation23_spill]] %s4479_s2 }
   0x4   :  { %4523 = sst [smem:[#allocation24_spill]] %s4480_s3 }
   0x5   :  { %4524 = sst [smem:[#allocation25_spill]] %s4481_s4 }
   0x6   :  { %4525 = sst [smem:[#allocation26_spill]] %s4482_s5 }
   0x7   :  { %4526 = sst [smem:[#allocation27_spill]] %s4483_s6 }
   0x8   :  { %4527 = sst [smem:[#allocation28_spill]] %s4484_s7 }
   0x9   :  { %4528 = sst [smem:[#allocation29_spill]] %s4485_s8 }
   0xa   :  { %4529 = sst [smem:[#allocation30_spill]] %s4486_s9 }
   0xb   :  { %4530 = sst [smem:[#allocation31_spill]] %s4487_s10 }
   0xc   :  { %4531 = sst [smem:[#allocation32_spill]] %s4488_s11 }
   0xd   :  { %4532 = sst [smem:[#allocation33_spill]] %s4489_s12 }
   0xe   :  { %4533 = sst [smem:[#allocation34_spill]] %s4490_s13 }
   0xf   :  { %4534 = sst [smem:[#allocation35_spill]] %s4491_s14 }
  0x10   :  { %4535 = sst [smem:[#allocation36_spill]] %s4493_s16 }
  0x11   :  { %4536 = sst [smem:[#allocation37_spill]] %s4497_s20 }
  0x12   :  { %4537 = sst [smem:[#allocation38_spill]] %s4498_s21 }
  0x13   :  { %4538 = sst [smem:[#allocation39_spill]] %s4499_s22 }
  0x14   :  { %4539 = sst [smem:[#allocation40_spill]] %s4500_s23 }
  0x15   :  { %4540 = sst [smem:[#allocation41_spill]] %s4501_s24 }
  0x16   :  { %29 = vsyncpa [#allocation4], 0 }
  0x17   :  { %31 = vsyncpa [#allocation4 + $0x1], 0  ;;  %s3925_s5 = smov 0   ;;  %s3927_s26 = smov 0  }
  0x18   :  { %s3929_s27 = smov 0   ;;  %s3931_s28 = smov 0  }
  0x19   :  { %s3933_s6 = smov 0   ;;  %s3935_s2 = smov 0  }
  0x1a   :  { %s3937_s29 = smov 0   ;;  %s3939_s0 = smov 0  }
  0x1b LB: > { %4541 = sst [smem:[#allocation6_spill]] %s3766_s5  ;;  %s3147_s7 = sadd.s32 4294967295, %s3794_s0   ;;  %s3794_s0 = sphi %s3939_s0, %s37_s0   ;;  %s3790_s29 = sphi %s3937_s29, %s4604_s29   ;;  %s3786_s2 = sphi %s3935_s2, %s4603_s2   ;;  %s3782_s6 = sphi %s3933_s6, %s4602_s6   ;;  %s3778_s28 = sphi %s3931_s28, %s4601_s28   ;;  %s3774_s27 = sphi %s3929_s27, %s4600_s27   ;;  %s3770_s26 = sphi %s3927_s26, %s4599_s26   ;;  %s3766_s5 = sphi %s3925_s5, %s4598_s5  }
  0x1c   : > { %4542 = sst [smem:[#allocation7_spill]] %s3770_s26  ;;  %s3148_s30 = sadd.s32 4294967294, %s3794_s0  }
  0x1d   : > { %4543 = sst [smem:[#allocation8_spill]] %s3774_s27  ;;  %s46_s3 = sadd.s32 1, %s3786_s2 }
  0x1e   : > { %4544 = sst [smem:[#allocation9_spill]] %s3778_s28  ;;  %p47_p0 = scmp.ge.s32.totalorder %s46_s3, 2 }
  0x1f   : > { %4545 = sst [smem:[#allocation10_spill]] %s3782_s6  ;;  %s49_s25 = sadd.s32 1, %s3790_s29 }
  0x20   : > { %4546 = sst [smem:[#allocation11_spill]] %s3786_s2  ;;  %p655_p1 = scmp.ne.s32.totalorder %s3774_s27, %s3770_s26 }
  0x21   : > { %4547 = sst [smem:[#allocation12_spill]] %s3790_s29  ;;  %p656_p2 = scmp.eq.s32.totalorder %s3147_s7, 3 }
  0x22   : > { %4548 = sst [smem:[#allocation13_spill]] %s3794_s0  ;;  %s4606_s3 = smov (%p47_p0, %s46_s3), 0 }
  0x23   : > { %4549 = sst [smem:[#allocation14_spill]] %s4606_s3  ;;  %s4608_s25 = smov (!%p47_p0, %s49_s25), %s3790_s29 }
  0x24   : > { %p3974_p3 = por %p656_p2, %p655_p1  ;;  %p661_p4 = scmp.ne.s32.totalorder %s3770_s26, %s3766_s5 }
  0x25   : > { %p51_p5 = scmp.ge.s32.totalorder %s4608_s25, 2  ;;  %p662_p6 = scmp.eq.s32.totalorder %s3148_s30, 3 }
  0x26   : > { %s4550_s8 = scalar_select %p3974_p3, 1, 0 }
  0x27   : > { %p3151_p7 = scmp.ge.s32.totalorder %s3794_s0, 1  ;;  %p820_p8 = scmp.lt.s32.totalorder %s3794_s0, 5 }
  0x28   : > { %4551 = sst [smem:[#allocation15_spill]] %s4550_s8  ;;  %s4610_s25 = smov (%p51_p5, %s4608_s25), 0 }
  0x29   : > { %4552 = sst [smem:[#allocation16_spill]] %s4610_s25  ;;  %p3984_p9 = por %p662_p6, %p661_p4 }
  0x2a   : > { %p821_p10 = pnand %p3151_p7, %p820_p8  ;;  %s642_s1 = ssub.s32 %s3790_s29, %s4610_s25 }
  0x2b   : > { %s4553_s4 = scalar_select %p3984_p9, 1, 0 }
  0x2c   : > { %s645_s7 = sadd.s32 1, %s3774_s27  ;;  %p643_p11 = scmp.eq.s32.totalorder %s642_s1, 0 }
  0x2d   : > { %4554 = sst [smem:[#allocation17_spill]] %s4553_s4  ;;  %824 = sbr.rel (%p821_p10) target bundleno = 3320 (0xcf8), region = 116 }
  0x2e   : > { %s3992_s3 = scalar_select %p643_p11, %s3774_s27, %s645_s7  }
  0x30   : > { %4555 = sst [smem:[#allocation18_spill]] %s3992_s3 }
  0x34   : > { %s4508_s30 = sand.u32 1, %s3770_s26   ;;  %p949_p12 = scmp.lt.s32.totalorder %s3782_s6, 1 }
  0x35   : > { %s3998_s2 = sshll.u32 %s4508_s30, 3  ;;  %p954_p13 = scmp.lt.s32.totalorder %s3778_s28, 1 }
  0x36   : > { %s950_s4 = scalar_select %p949_p12, %s3782_s6, 1 }
  0x37   : > { %s4003_s5 = scalar_select %p954_p13, %s3778_s28, 1 }
  0x38   : > { %s3275_s1 = sshll.u32 %s950_s4, 3  ;;  %s4556_s29 = sld [smem:[#allocation21_spill]] }
  0x39   : > { %s3276_s22 = sshll.u32 %s4003_s5, 6  ;;  %s4559_s20 = sld [smem:[#allocation29_spill]] }
  0x3a   : > { %s4560_s9 = sld [smem:[#allocation30_spill]]  ;;  %s4561_s10 = sld [smem:[#allocation31_spill]] }
  0x3b   : > { %s3161_s26 = sshll.u32 %s4003_s5, 2  ;;  %s4562_s11 = sld [smem:[#allocation32_spill]] }
  0x3c   : > { %s4564_s12 = sld [smem:[#allocation33_spill]]  ;;  %s4565_s13 = sld [smem:[#allocation34_spill]] }
  0x3d   : > { %s3279_s24 = sshll.u32 %s4003_s5, 4  ;;  %s4566_s14 = sld [smem:[#allocation35_spill]] }
  0x3e   : > { %s4008_s3 = scalar_lea.vmem %s4556_s29, %s3275_s1  ;;  %s1000_s25 = scalar_lea.vmem %s4494_s17, %s4003_s5 }
  0x3f   : > { %s4022_s4 = scalar_lea.vmem %s4559_s20, %s3276_s22  ;;  %s4569_s6 = sld [smem:[#allocation37_spill]] }
  0x40   : > { %s4027_s29 = scalar_lea.vmem %s4560_s9, %s3276_s22  ;;  %s4032_s30 = scalar_lea.vmem %s4561_s10, %s3276_s22 }
  0x41   : > { %s4038_s1 = scalar_lea.vmem %s4562_s11, %s3161_s26  ;;  %s4570_s21 = sld [smem:[#allocation38_spill]] }
  0x42   : > { %4563 = sst [smem:[#allocation19_spill]] %s4038_s1  ;;  %s4043_s28 = scalar_lea.vmem %s4564_s12, %s3161_s26 }
  0x43   : > { %s4048_s23 = scalar_lea.vmem %s4565_s13, %s3161_s26  ;;  %s4054_s9 = scalar_lea.vmem %s4566_s14, %s3279_s24 }
  0x44   : > { %4567 = sst [smem:[#allocation20_spill]] %s4054_s9  ;;  %s4071_s13 = scalar_lea.vmem %s4495_s18, %s3279_s24 }
  0x45   : > { %s1008_s14 = scalar_lea.vmem %s4496_s19, %s4003_s5  ;;  %s4080_s8 = scalar_lea.vmem %s4569_s6, %s3276_s22 }
  0x46   : > { %s948_s12 = scalar_lea.vmem [#allocation3], %s3998_s2  ;;  %s4571_s20 = sld [smem:[#allocation9_spill]] }
  0x47   : > { %s1016_s16 = scalar_lea.vmem %s4570_s21, %s4003_s5 }
  0x4c   : > { %p3170_p0 = scmp.ne.s32.totalorder %s4571_s20, 0 }
  0x4d   : > { %s4572_s7 = sld [smem:[#allocation22_spill]] (!%p3170_p0)  ;;  %v3796_v1 = vmov (!%p3170_p0), 0   ;;  %v1022_v5 = vld [vmem:[%s4008_s3] sm:$0xff] (!%p3170_p0)  ;;  %vm1126_vm0 = vcmask (!%p3170_p0), 523264   ;;  %s4573_s24 = sld [smem:[#allocation23_spill]] (!%p3170_p0)  ;;  %vm1172_vm1 = vcmask (!%p3170_p0), 261120  }
  0x4e   : > { %1021 = sbr.rel (%p3170_p0) target bundleno = 659 (0x293), region = 120  ;;  %1130 = vmatprep.subr.bf16.mxu0 (!%p3170_p0), %v3796_v1  ;;  %v3172_v6 = vcombine.high (!%p3170_p0), %v1022_v5, %v1022_v5  ;;  %v3171_v15 = vcombine.low (!%p3170_p0), %v1022_v5, %v1022_v5  ;;  %s4574_s9 = sld [smem:[#allocation25_spill]] (!%p3170_p0) }
  0x4f   : > { %s4575_s0 = sld [smem:[#allocation26_spill]] (!%p3170_p0) }
  0x50   : > { %3185 = vmatprep.mubr.msk.bf16.mxu0 (!%p3170_p0), %vm1126_vm0, %v3172_v6 }
  0x53   : > { %v3624_v0 = vld [vmem:[%s4572_s7] sm:$0xff] (!%p3170_p0)   ;;  %v3625_v2 = vld [vmem:[%s4572_s7 + $0x8] sm:$0xff] (!%p3170_p0)   ;;  %v3626_v3 = vld [vmem:[%s4572_s7 + $0x10] sm:$0xff] (!%p3170_p0)  }
  0x54   : > { %1131 = vmatpush1.bf16.msra.mxu0 (!%p3170_p0), %v3624_v0  ;;  %v3627_v4 = vld [vmem:[%s4572_s7 + $0x18] sm:$0xff] (!%p3170_p0)   ;;  %v3628_v7 = vld [vmem:[%s4572_s7 + $0x20] sm:$0xff] (!%p3170_p0)   ;;  %v3629_v8 = vld [vmem:[%s4572_s7 + $0x28] sm:$0xff] (!%p3170_p0)  }
  0x55   : > { %1132 = vmatprep.subr.bf16.mxu0 %v3796_v1  ;;  %v3630_v9 = vld [vmem:[%s4572_s7 + $0x30] sm:$0xff]   ;;  %v3631_v10 = vld [vmem:[%s4572_s7 + $0x38] sm:$0xff]   ;;  %v3632_v11 = vld [vmem:[%s4572_s7 + $0x40] sm:$0xff]  }
  0x56   : > { %v3633_v12 = vld [vmem:[%s4572_s7 + $0x48] sm:$0xff]   ;;  %v3634_v13 = vld [vmem:[%s4572_s7 + $0x50] sm:$0xff]   ;;  %v3635_v14 = vld [vmem:[%s4572_s7 + $0x58] sm:$0xff]  }
  0x57   : > { %v1047_v16 = vld [vmem:[%s4573_s24] sm:$0xff] }
  0x58   : > { %1133 = vmatpush1.bf16.msra.mxu0 %v3625_v2  ;;  %v3186_v32 = vld [vmem:[%s4574_s9] ss:$0 sm:$0xff] }
  0x59   : > { %1134 = vmatprep.subr.bf16.mxu0 %v3796_v1  ;;  %v3187_v34 = vld [vmem:[%s4575_s0] ss:$0 sm:$0xff] }
  0x5c   : > { %1135 = vmatpush1.bf16.msra.mxu0 %v3626_v3 }
  0x5d   : > { %1136 = vmatprep.subr.bf16.mxu0 %v3796_v1 }
  0x60   : > { %1137 = vmatpush1.bf16.msra.mxu0 %v3627_v4 }
  0x61   : > { %1138 = vmatprep.subr.bf16.mxu0 %v3796_v1 }
  0x64   : > { %1139 = vmatpush1.bf16.msra.mxu0 %v3628_v7 }
  0x65   : > { %1140 = vmatprep.subr.bf16.mxu0 %v3796_v1 }
  0x68   : > { %1141 = vmatpush1.bf16.msra.mxu0 %v3629_v8 }
  0x69   : > { %1142 = vmatprep.subr.bf16.mxu0 %v3796_v1 }
  0x6c   : > { %1143 = vmatpush1.bf16.msra.mxu0 %v3630_v9 }
  0x6d   : > { %1144 = vmatprep.subr.bf16.mxu0 %v3796_v1 }
  0x70   : > { %1145 = vmatpush1.bf16.msra.mxu0 %v3631_v10 }
  0x71   : > { %1146 = vmatprep.subr.bf16.mxu0 %v3796_v1 }
  0x74   : > { %1147 = vmatpush1.bf16.msra.mxu0 %v3632_v11 }
  0x75   : > { %1148 = vmatprep.subr.bf16.mxu0 %v3796_v1 }
  0x78   : > { %1149 = vmatpush1.bf16.msra.mxu0 %v3633_v12 }
  0x79   : > { %1150 = vmatprep.subr.bf16.mxu0 %v3796_v1 }
  0x7c   : > { %1151 = vmatpush1.bf16.msra.mxu0 %v3634_v13 }
  0x7d   : > { %1152 = vmatprep.subr.bf16.mxu0 %v3796_v1 }
  0x80   : > { %1153 = vmatpush1.bf16.msra.mxu0 %v3635_v14 }
  0x83   : > { %1163 = vmatmul.mubr.bf16.vlgmr.msra.gmra.mrb[0].mxu0 %v3171_v15 }
 0x156   : > { %v1164_v17 = vpop.f32.mrb[0].mxu0 }
 0x157   : > { %v1165_v18 = vadd.f32 %v1164_v17, %v1047_v16  ;;  %v1166_v19 = vpop.f32.mrb[1].mxu0 }
 0x158   : > { %v1167_v20 = vpop.f32.mrb[2].mxu0 }
 0x159   : > { %v1168_v21 = vpop.f32.mrb[3].mxu0  ;;  %v1173_v22 = vsel %vm1172_vm1, %v1165_v18, 0.0 }
 0x15a   : > { %1174 = vadd.xlane.f32.xlu0 %v1173_v22 }
 0x1e7   : > { %v1175_v23 = vpop.xlane.xlu0 %1174 }
 0x1e8   : > { %v1177_v24 = vmul.f32 0.03125, %v1175_v23 }
 0x1ea   : > { %v1178_v25 = vsub.f32 %v1165_v18, %v1177_v24 }
 0x1ec   : > { %v1179_v26 = vmul.f32 %v1178_v25, %v1178_v25 }
 0x1ee   : > { %v1180_v27 = vsel %vm1172_vm1, %v1179_v26, 0.0 }
 0x1ef   : > { %1181 = vadd.xlane.f32.xlu0 %v1180_v27 }
 0x27c   : > { %v1182_v28 = vpop.xlane.xlu0 %1181 }
 0x27d   : > { %v1183_v29 = vmul.f32 0.03125, %v1182_v28 }
 0x27f   : > { %v1184_v30 = vadd.f32 1e-05, %v1183_v29 }
 0x281   : > { %3638 = vrsqrt.f32 %v1184_v30 }
 0x28b   : > { %v3639_v31 = vpop.eup %3638 }
 0x28c   : > { %v1186_v33 = vmul.f32 %v3639_v31, %v1178_v25 }
 0x28e   : > { %v1193_v35 = vmul.f32 %v3186_v32, %v1186_v33 }
 0x290   : > { %v1200_v36 = vadd.f32 %v3187_v34, %v1193_v35 }
 0x292   : > { %1201 = vst.msk [vmem:[#allocation2] sm:$0xff] %vm1172_vm1, %v1200_v36 }
 0x293 PF: > { %vm1205_vm2 = vcmask 261120   ;;  %v3640_v44 = vld [vmem:[%s4022_s4] sm:$0xff]   ;;  %v3641_v45 = vld [vmem:[%s4022_s4 + $0x30] sm:$0xff]   ;;  %v3797_v46 = vmov 0.0   ;;  %v3642_v47 = vld [vmem:[%s4022_s4 + $0x8] sm:$0xff]   ;;  %vm3798_vm3 = vmmov 0   ;;  %s4583_s22 = scalar_lea.vmem %s4492_s15, %s4003_s5 }
 0x294   : > { %3354 = vmatprep.subr.bf16.mxu0 %v3797_v46  ;;  %3378 = vmatprep.subr.bf16.mxu1 %v3797_v46  ;;  %v3643_v48 = vld [vmem:[%s4022_s4 + $0x38] sm:$0xff]   ;;  %s4576_s11 = sld [smem:[#allocation27_spill]]  ;;  %s4578_s24 = sld [smem:[#allocation28_spill]]  ;;  %v3644_v58 = vld [vmem:[%s4022_s4 + $0x10] sm:$0xff]   ;;  %v3648_v63 = vld [vmem:[%s4022_s4 + $0x20] sm:$0xff]   ;;  %vm2009_vm4 = vcmask 64512  }
 0x295   : > { %3355 = vmatpush3.bf16.msra.mxu0 %v3640_v44  ;;  %3379 = vmatpush3.bf16.msra.mxu1 %v3641_v45  ;;  %v3645_v59 = vld [vmem:[%s4027_s29 + $0x10] sm:$0xff]   ;;  %v3646_v61 = vld [vmem:[%s4022_s4 + $0x18] sm:$0xff]   ;;  %v3650_v1 = vld [vmem:[%s4022_s4 + $0x28] sm:$0xff]   ;;  %s4580_s4 = sld [smem:[#allocation19_spill]]  ;;  %vm2249_vm5 = vcmask 1043456   ;;  %s4582_s27 = sld [smem:[#allocation20_spill]] }
 0x296   : > { %3356 = vmatprep.subr.bf16.mxu0 %v3797_v46  ;;  %3380 = vmatprep.subr.bf16.mxu1 %v3797_v46  ;;  %v3647_v62 = vld [vmem:[%s4027_s29 + $0x18] sm:$0xff]   ;;  %v3649_v0 = vld [vmem:[%s4027_s29 + $0x30] sm:$0xff]   ;;  %v3652_v3 = vld [vmem:[%s4027_s29] sm:$0xff]   ;;  %s4584_s10 = sld [smem:[#allocation36_spill]]  ;;  %s4587_s26 = sld [smem:[#allocation9_spill]] }
 0x297   : > { %3358 = vmatprep.mubr.msk.bf16.mxu0 %vm3798_vm3, %v3797_v46  ;;  %3382 = vmatprep.mubr.msk.bf16.mxu1 %vm3798_vm3, %v3797_v46  ;;  %v3651_v2 = vld [vmem:[%s4027_s29 + $0x38] sm:$0xff]   ;;  %v3653_v4 = vld [vmem:[%s4032_s30 + $0x10] sm:$0xff]   ;;  %v3654_v5 = vld [vmem:[%s4027_s29 + $0x8] sm:$0xff]  }
 0x298   : > { %v3655_v6 = vld [vmem:[%s4032_s30 + $0x18] sm:$0xff]   ;;  %v3656_v7 = vld [vmem:[%s4027_s29 + $0x20] sm:$0xff]   ;;  %v3657_v8 = vld [vmem:[%s4032_s30 + $0x30] sm:$0xff]  }
 0x299   : > { %v4137_v37 = vld [vmem:[#allocation2] sm:$0xff]  ;;  %3357 = vmatpush3.bf16.msra.mxu0 %v3642_v47  ;;  %3381 = vmatpush3.bf16.msra.mxu1 %v3643_v48  ;;  %v3658_v9 = vld [vmem:[%s4027_s29 + $0x28] sm:$0xff]   ;;  %v3659_v10 = vld [vmem:[%s4032_s30 + $0x38] sm:$0xff]  }
 0x29a   : > { %v1206_v38 = vsel %vm1205_vm2, %v4137_v37, 0.0  ;;  %3362 = vmatprep.subr.bf16.mxu0 %v3797_v46  ;;  %3394 = vmatprep.subr.bf16.mxu1 %v3797_v46  ;;  %s4577_s1 = scalar_lea.vmem %s4576_s11, %s4003_s5  ;;  %s4579_s3 = scalar_lea.vmem %s4578_s24, %s4003_s5  ;;  %v3660_v11 = vld [vmem:[%s4032_s30] sm:$0xff]   ;;  %v3661_v12 = vld [vmem:[%s4032_s30 + $0x8] sm:$0xff]  }
 0x29b   : > { %1207 = vadd.xlane.f32.xlu0 %v1206_v38  ;;  %v3188_v53 = vld [vmem:[%s4577_s1] ss:$0 sm:$0xff]  ;;  %v3663_v14 = vld [vmem:[%s4032_s30 + $0x28] sm:$0xff]   ;;  %v3207_v23 = vld [vmem:[%s4043_s28 + $0x1] ss:$0 sm:$0xff] }
 0x29c   : > { %v3189_v55 = vld [vmem:[%s4579_s3] ss:$0 sm:$0xff]  ;;  %v3191_v34 = vld [vmem:[%s4580_s4 + $0x1] ss:$0 sm:$0xff]  ;;  %v3209_v36 = vld [vmem:[%s4043_s28 + $0x3] ss:$0 sm:$0xff]  ;;  %s4585_s6 = scalar_lea.vmem %s4584_s10, %s4003_s5 }
 0x29d   : > { %v3662_v13 = vld [vmem:[%s4032_s30 + $0x20] sm:$0xff]   ;;  %p3268_p1 = scmp.ne.s32.totalorder %s4587_s26, 1 }
 0x29e   : > { %s4588_s24 = sld [smem:[#allocation39_spill]] (!%p3268_p1)  ;;  %s4589_s29 = sld [smem:[#allocation40_spill]] (!%p3268_p1) }
 0x328   : > { %v1208_v39 = vpop.xlane.xlu0 %1207 }
 0x329   : > { %v1210_v40 = vmul.f32 0.03125, %v1208_v39 }
 0x32b   : > { %v1211_v41 = vsub.f32 %v4137_v37, %v1210_v40 }
 0x32d   : > { %v1212_v42 = vmul.f32 %v1211_v41, %v1211_v41 }
 0x32f   : > { %v1213_v43 = vsel %vm1205_vm2, %v1212_v42, 0.0 }
 0x330   : > { %1214 = vadd.xlane.f32.xlu0 %v1213_v43 }
 0x3bd   : > { %v1215_v49 = vpop.xlane.xlu0 %1214 }
 0x3be   : > { %v1216_v50 = vmul.f32 0.03125, %v1215_v49 }
 0x3c0   : > { %v1217_v51 = vadd.f32 1e-05, %v1216_v50 }
 0x3c2   : > { %3674 = vrsqrt.f32 %v1217_v51  ;;  %v3193_v51 = vld [vmem:[%s4580_s4 + $0x3] ss:$0 sm:$0xff] }
 0x3cc   : > { %v3675_v52 = vpop.eup %3674 }
 0x3cd   : > { %v1219_v54 = vmul.f32 %v3675_v52, %v1211_v41 }
 0x3cf   : > { %v1226_v56 = vmul.f32 %v3188_v53, %v1219_v54  ;;  %v3206_v53 = vld [vmem:[%s4043_s28] ss:$0 sm:$0xff]  ;;  %v3223_v54 = vld [vmem:[%s4048_s23 + $0x1] ss:$0 sm:$0xff] }
 0x3d1   : > { %v1233_v57 = vadd.f32 %v3189_v55, %v1226_v56 }
 0x3d3   : > { %v4169_v60 = vpack.c.bf16 %v1233_v57, %v1233_v57 }
 0x3d5   : > { %3359 = vmatmul.mubr.msk.bf16.vlgmr.msra.gmra.mrb[0].mxu0 %vm1205_vm2, %v4169_v60  ;;  %3383 = vmatmul.mubr.msk.bf16.vlgmr.msra.gmra.mrb[0].mxu1 %vm1205_vm2, %v4169_v60 }
 0x3d6   : > { %3363 = vmatpush3.bf16.msra.mxu0 %v3644_v58  ;;  %3395 = vmatpush3.bf16.msra.mxu1 %v3645_v59 }
 0x3d7   : > { %3364 = vmatprep.subr.bf16.mxu0 %v3797_v46  ;;  %3396 = vmatprep.subr.bf16.mxu1 %v3797_v46 }
 0x3d8   : > { %3366 = vmatprep.mubr.msk.bf16.mxu0 %vm3798_vm3, %v3797_v46  ;;  %3398 = vmatprep.mubr.msk.bf16.mxu1 %vm3798_vm3, %v3797_v46 }
 0x3da   : > { %3365 = vmatpush3.bf16.msra.mxu0 %v3646_v61  ;;  %3397 = vmatpush3.bf16.msra.mxu1 %v3647_v62 }
 0x3db   : > { %3370 = vmatprep.subr.bf16.mxu0 %v3797_v46  ;;  %3410 = vmatprep.subr.bf16.mxu1 %v3797_v46 }
 0x3dd   : > { %3367 = vmatmul.mubr.msk.bf16.vlgmr.msra.gmra.mrb[4].mxu0 %vm1205_vm2, %v4169_v60  ;;  %3399 = vmatmul.mubr.msk.bf16.vlgmr.msra.gmra.mrb[4].mxu1 %vm1205_vm2, %v4169_v60 }
 0x3de   : > { %3371 = vmatpush3.bf16.msra.mxu0 %v3648_v63  ;;  %3411 = vmatpush3.bf16.msra.mxu1 %v3649_v0 }
 0x3df   : > { %3372 = vmatprep.subr.bf16.mxu0 %v3797_v46  ;;  %3412 = vmatprep.subr.bf16.mxu1 %v3797_v46 }
 0x3e0   : > { %3374 = vmatprep.mubr.msk.bf16.mxu0 %vm3798_vm3, %v3797_v46  ;;  %3414 = vmatprep.mubr.msk.bf16.mxu1 %vm3798_vm3, %v3797_v46 }
 0x3e2   : > { %3373 = vmatpush3.bf16.msra.mxu0 %v3650_v1  ;;  %3413 = vmatpush3.bf16.msra.mxu1 %v3651_v2 }
 0x3e3   : > { %3386 = vmatprep.subr.bf16.mxu0 %v3797_v46  ;;  %3426 = vmatprep.subr.bf16.mxu1 %v3797_v46 }
 0x3e5   : > { %3375 = vmatmul.mubr.msk.bf16.vlgmr.msra.gmra.mrb[8].mxu0 %vm1205_vm2, %v4169_v60  ;;  %3415 = vmatmul.mubr.msk.bf16.vlgmr.msra.gmra.mrb[8].mxu1 %vm1205_vm2, %v4169_v60 }
 0x3e6   : > { %3387 = vmatpush3.bf16.msra.mxu0 %v3652_v3  ;;  %3427 = vmatpush3.bf16.msra.mxu1 %v3653_v4 }
 0x3e7   : > { %3388 = vmatprep.subr.bf16.mxu0 %v3797_v46  ;;  %3428 = vmatprep.subr.bf16.mxu1 %v3797_v46 }
 0x3e8   : > { %3390 = vmatprep.mubr.msk.bf16.mxu0 %vm3798_vm3, %v3797_v46  ;;  %3430 = vmatprep.mubr.msk.bf16.mxu1 %vm3798_vm3, %v3797_v46 }
 0x3ea   : > { %3389 = vmatpush3.bf16.msra.mxu0 %v3654_v5  ;;  %3429 = vmatpush3.bf16.msra.mxu1 %v3655_v6  ;;  %v3190_v5 = vld [vmem:[%s4580_s4] ss:$0 sm:$0xff] }
 0x3eb   : > { %3402 = vmatprep.subr.bf16.mxu0 %v3797_v46  ;;  %3442 = vmatprep.subr.bf16.mxu1 %v3797_v46 }
 0x3ed   : > { %3391 = vmatmul.mubr.msk.bf16.vlgmr.msra.gmra.mrb[12].mxu0 %vm1205_vm2, %v4169_v60  ;;  %3431 = vmatmul.mubr.msk.bf16.vlgmr.msra.gmra.mrb[12].mxu1 %vm1205_vm2, %v4169_v60 }
 0x3ee   : > { %3403 = vmatpush3.bf16.msra.mxu0 %v3656_v7  ;;  %3443 = vmatpush3.bf16.msra.mxu1 %v3657_v8  ;;  %v3208_v8 = vld [vmem:[%s4043_s28 + $0x2] ss:$0 sm:$0xff]  ;;  %s4581_s28 = sld [smem:[#allocation24_spill]] }
 0x3ef   : > { %3404 = vmatprep.subr.bf16.mxu0 %v3797_v46  ;;  %3444 = vmatprep.subr.bf16.mxu1 %v3797_v46 }
 0x3f0   : > { %3406 = vmatprep.mubr.msk.bf16.mxu0 %vm3798_vm3, %v3797_v46  ;;  %3446 = vmatprep.mubr.msk.bf16.mxu1 %vm3798_vm3, %v3797_v46 }
 0x3f2   : > { %3405 = vmatpush3.bf16.msra.mxu0 %v3658_v9  ;;  %3445 = vmatpush3.bf16.msra.mxu1 %v3659_v10 }
 0x3f3   : > { %3418 = vmatprep.subr.bf16.mxu0 %v3797_v46  ;;  %3456 = vmatprep.subr.bf16.mxu1 %v3797_v46 }
 0x3f5   : > { %3407 = vmatmul.mubr.msk.bf16.vlgmr.msra.gmra.mrb[16].mxu0 %vm1205_vm2, %v4169_v60  ;;  %3447 = vmatmul.mubr.msk.bf16.vlgmr.msra.gmra.mrb[16].mxu1 %vm1205_vm2, %v4169_v60 }
 0x3f6   : > { %3419 = vmatpush3.bf16.msra.mxu0 %v3660_v11  ;;  %3422 = vmatprep.mubr.msk.bf16.mxu0 %vm3798_vm3, %v3797_v46 }
 0x3f7   : > { %3420 = vmatprep.subr.bf16.mxu0 %v3797_v46  ;;  %3458 = vmatprep.mubr.msk.bf16.mxu1 %vm3798_vm3, %v3797_v46 }
 0x3fa   : > { %3421 = vmatpush3.bf16.msra.mxu0 %v3661_v12 }
 0x3fb   : > { %3434 = vmatprep.subr.bf16.mxu0 %v3797_v46 }
 0x3fd   : > { %3423 = vmatmul.mubr.msk.bf16.vlgmr.msra.gmra.mrb[20].mxu0 %vm1205_vm2, %v4169_v60 }
 0x3fe   : > { %3435 = vmatpush3.bf16.msra.mxu0 %v3662_v13  ;;  %3438 = vmatprep.mubr.msk.bf16.mxu0 %vm3798_vm3, %v3797_v46 }
 0x3ff   : > { %3436 = vmatprep.subr.bf16.mxu0 %v3797_v46 }
 0x402   : > { %3437 = vmatpush3.bf16.msra.mxu0 %v3663_v14 }
 0x403   : > { %3450 = vmatprep.subr.bf16.mxu0 %v3797_v46 }
 0x405   : > { %3439 = vmatmul.mubr.msk.bf16.vlgmr.msra.gmra.mrb[24].mxu0 %vm1205_vm2, %v4169_v60 }
 0x406   : > { %3452 = vmatprep.mubr.msk.bf16.mxu0 %vm3798_vm3, %v3797_v46 }
 0x4a8   : > { %v4257_v15 = vpop.f32.mrb[0].mxu0  ;;  %v1484_v16 = vpop.f32.mrb[0].mxu1 }
 0x4a9   : > { %v3360_v17 = vpop.f32.mrb[1].mxu0  ;;  %v3384_v18 = vpop.f32.mrb[1].mxu1  ;;  %v1485_v55 = vadd.f32 %v3193_v51, %v1484_v16  ;;  %v1329_v9 = vadd.f32 %v3190_v5, %v4257_v15 }
 0x4aa   : > { %v1331_v19 = vpop.f32.mrb[2].mxu0  ;;  %v1487_v20 = vpop.f32.mrb[2].mxu1 }
 0x4ab   : > { %v3361_v21 = vpop.f32.mrb[3].mxu0  ;;  %v3385_v22 = vpop.f32.mrb[3].mxu1  ;;  %v1997_v0 = vpack.c.bf16 %v1485_v55, %v1485_v55  ;;  %v1994_v18 = vpack.c.bf16 %v1329_v9, %v1329_v9 }
 0x4ac   : > { %v3192_v21 = vld [vmem:[%s4580_s4 + $0x2] ss:$0 sm:$0xff] }
 0x4b0   : > { %v1380_v24 = vpop.f32.mrb[4].mxu0  ;;  %v1632_v25 = vpop.f32.mrb[4].mxu1 }
 0x4b1   : > { %v1633_v26 = vadd.f32 %v3207_v23, %v1632_v25  ;;  %v3368_v27 = vpop.f32.mrb[5].mxu0  ;;  %v3400_v28 = vpop.f32.mrb[5].mxu1  ;;  %v1381_v38 = vadd.f32 %v3191_v34, %v1380_v24  ;;  %v3222_v23 = vld [vmem:[%s4048_s23] ss:$0 sm:$0xff] }
 0x4b2   : > { %v1383_v29 = vpop.f32.mrb[6].mxu0  ;;  %v1635_v30 = vpop.f32.mrb[6].mxu1 }
 0x4b3   : > { %v1999_v31 = vpack.c.bf16 %v1633_v26, %v1633_v26  ;;  %v3369_v32 = vpop.f32.mrb[7].mxu0  ;;  %v3401_v33 = vpop.f32.mrb[7].mxu1  ;;  %v1995_v47 = vpack.c.bf16 %v1381_v38, %v1381_v38 }
 0x4b5   : > { %v2060_v35 = vsel %vm2009_vm4, %v1999_v31, 0 }
 0x4b6   : > { %3457 = vmatpush3.bf16.xpose.msra.mxu1 %v2060_v35 }
 0x4b7   : > { %3468 = vmatprep.subr.bf16.mxu1 %v3797_v46 }
 0x4b8   : > { %v1432_v39 = vpop.f32.mrb[8].mxu0  ;;  %v1736_v40 = vpop.f32.mrb[8].mxu1 }
 0x4b9   : > { %v1737_v41 = vadd.f32 %v3209_v36, %v1736_v40  ;;  %v3376_v42 = vpop.f32.mrb[9].mxu0  ;;  %v3416_v43 = vpop.f32.mrb[9].mxu1  ;;  %v1433_v24 = vadd.f32 %v3192_v21, %v1432_v39 }
 0x4ba   : > { %v1435_v44 = vpop.f32.mrb[10].mxu0  ;;  %v1739_v45 = vpop.f32.mrb[10].mxu1 }
 0x4bb   : > { %v2001_v48 = vpack.c.bf16 %v1737_v41, %v1737_v41  ;;  %v3377_v49 = vpop.f32.mrb[11].mxu0  ;;  %v3417_v50 = vpop.f32.mrb[11].mxu1  ;;  %v1996_v29 = vpack.c.bf16 %v1433_v24, %v1433_v24 }
 0x4bd   : > { %v2152_v52 = vsel %vm2009_vm4, %v2001_v48, 0  ;;  %3459 = vmatmul.mubr.msk.bf16.vlgmr.msra.gmra.mrb[20].mxu1 %vm2009_vm4, %v1995_v47  ;;  %v3238_v47 = vld [vmem:[%s4581_s28] ss:$0 sm:$0xff] }
 0x4be   : > { %3469 = vmatpush3.bf16.xpose.msra.mxu1 %v2152_v52  ;;  %3470 = vmatprep.mubr.msk.bf16.mxu1 %vm3798_vm3, %v3797_v46 }
 0x4bf   : > { %3480 = vmatprep.subr.bf16.mxu1 %v3797_v46 }
 0x4c0   : > { %v1580_v56 = vpop.f32.mrb[12].mxu0  ;;  %v1884_v57 = vpop.f32.mrb[12].mxu1 }
 0x4c1   : > { %v1581_v58 = vadd.f32 %v3206_v53, %v1580_v56  ;;  %v1885_v59 = vadd.f32 %v3223_v54, %v1884_v57  ;;  %v3392_v60 = vpop.f32.mrb[13].mxu0  ;;  %v3432_v61 = vpop.f32.mrb[13].mxu1 }
 0x4c2   : > { %v1583_v62 = vpop.f32.mrb[14].mxu0  ;;  %v1887_v63 = vpop.f32.mrb[14].mxu1 }
 0x4c3   : > { %v1998_v1 = vpack.c.bf16 %v1581_v58, %v1581_v58  ;;  %v2243_v2 = vpack.c.bf16 %v1885_v59, %v1885_v59  ;;  %v3393_v3 = vpop.f32.mrb[15].mxu0  ;;  %v3433_v4 = vpop.f32.mrb[15].mxu1 }
 0x4c5   : > { %v2014_v6 = vsel %vm2009_vm4, %v1998_v1, 0  ;;  %v2297_v7 = vsel %vm2249_vm5, %v2243_v2, 0  ;;  %3471 = vmatmul.mubr.msk.bf16.vlgmr.msra.gmra.mrb[24].mxu1 %vm2009_vm4, %v1997_v0 }
 0x4c6   : > { %3451 = vmatpush3.bf16.xpose.msra.mxu0 %v2014_v6  ;;  %3481 = vmatpush3.bf16.msra.mxu1 %v2297_v7 }
 0x4c7   : > { %3462 = vmatprep.subr.bf16.mxu0 %v3797_v46  ;;  %3482 = vmatprep.mubr.msk.bf16.mxu1 %vm3798_vm3, %v3797_v46 }
 0x4c8   : > { %v1684_v10 = vpop.f32.mrb[16].mxu0  ;;  %v4281_v11 = vpop.f32.mrb[16].mxu1  ;;  %3492 = vmatprep.subr.bf16.mxu1 %v3797_v46 }
 0x4c9   : > { %v1685_v12 = vadd.f32 %v3208_v8, %v1684_v10  ;;  %v3408_v13 = vpop.f32.mrb[17].mxu0  ;;  %v3448_v14 = vpop.f32.mrb[17].mxu1 }
 0x4ca   : > { %v1687_v16 = vpop.f32.mrb[18].mxu0  ;;  %v1991_v17 = vpop.f32.mrb[18].mxu1 }
 0x4cb   : > { %v2000_v19 = vpack.c.bf16 %v1685_v12, %v1685_v12  ;;  %v3409_v20 = vpop.f32.mrb[19].mxu0  ;;  %v3449_v15 = vpop.f32.mrb[19].mxu1 }
 0x4cd   : > { %v2106_v22 = vsel %vm2009_vm4, %v2000_v19, 0  ;;  %3453 = vmatmul.mubr.msk.bf16.vlgmr.msra.gmra.mrb[28].mxu0 %vm2009_vm4, %v1994_v18 }
 0x4ce   : > { %3463 = vmatpush3.bf16.xpose.msra.mxu0 %v2106_v22  ;;  %3464 = vmatprep.mubr.msk.bf16.mxu0 %vm3798_vm3, %v3797_v46 }
 0x4cf   : > { %3474 = vmatprep.subr.bf16.mxu0 %v3797_v46 }
 0x4d0   : > { %v1832_v25 = vpop.f32.mrb[20].mxu0 }
 0x4d1   : > { %v1833_v26 = vadd.f32 %v3222_v23, %v1832_v25  ;;  %v3424_v27 = vpop.f32.mrb[21].mxu0  ;;  %v3224_v23 = vld [vmem:[%s4048_s23 + $0x2] ss:$0 sm:$0xff] }
 0x4d2   : > { %v1835_v28 = vpop.f32.mrb[22].mxu0 }
 0x4d3   : > { %v2242_v30 = vpack.c.bf16 %v1833_v26, %v1833_v26  ;;  %v3425_v31 = vpop.f32.mrb[23].mxu0  ;;  %v3225_v26 = vld [vmem:[%s4048_s23 + $0x3] ss:$0 sm:$0xff] }
 0x4d5   : > { %v2251_v32 = vsel %vm2249_vm5, %v2242_v30, 0  ;;  %3465 = vmatmul.mubr.msk.bf16.vlgmr.msra.gmra.mrb[32].mxu0 %vm2009_vm4, %v1996_v29  ;;  %v1989_v29 = vadd.f32 %v3225_v26, %v4281_v11 }
 0x4d6   : > { %3475 = vmatpush3.bf16.msra.mxu0 %v2251_v32  ;;  %3476 = vmatprep.mubr.msk.bf16.mxu0 %vm3798_vm3, %v3797_v46 }
 0x4d7   : > { %3486 = vmatprep.subr.bf16.mxu0 %v3797_v46 }
 0x4d8   : > { %v4296_v33 = vpop.f32.mrb[24].mxu0 }
 0x4d9   : > { %v3440_v34 = vpop.f32.mrb[25].mxu0  ;;  %v1937_v24 = vadd.f32 %v3224_v23, %v4296_v33 }
 0x4da   : > { %v1939_v35 = vpop.f32.mrb[26].mxu0 }
 0x4db   : > { %v3441_v36 = vpop.f32.mrb[27].mxu0  ;;  %v2244_v30 = vpack.c.bf16 %v1937_v24, %v1937_v24  ;;  %v2245_v35 = vpack.c.bf16 %v1989_v29, %v1989_v29 }
 0x4dd   : > { %v2343_v36 = vsel %vm2249_vm5, %v2244_v30, 0 }
 0x590   : > { %v2096_v38 = vpop.f32.mrb[20].mxu1 }
 0x591   : > { %v3460_v39 = vpop.f32.mrb[21].mxu1  ;;  %v2097_v52 = vadd.f32 %v3238_v47, %v2096_v38 }
 0x592   : > { %v2099_v40 = vpop.f32.mrb[22].mxu1 }
 0x593   : > { %v3461_v41 = vpop.f32.mrb[23].mxu1  ;;  %v2197_v56 = vsel %vm2009_vm4, %v2097_v52, -inf  ;;  %v2389_v40 = vsel %vm2249_vm5, %v2245_v35, 0  ;;  %v3251_v35 = vld [vmem:[%s4583_s22] ss:$0 sm:$0xff] }
 0x594   : > { %v2435_v41 = vld [vmem:[%s4582_s27] sm:$0xf] }
 0x598   : > { %v2188_v42 = vpop.f32.mrb[24].mxu1 }
 0x599   : > { %v3472_v43 = vpop.f32.mrb[25].mxu1  ;;  %v2189_v55 = vadd.f32 %v3238_v47, %v2188_v42 }
 0x59a   : > { %v2191_v44 = vpop.f32.mrb[26].mxu1 }
 0x59b   : > { %v3473_v45 = vpop.f32.mrb[27].mxu1  ;;  %v2203_v62 = vsel %vm2009_vm4, %v2189_v55, -inf }
 0x59c   : > { %v2443_v45 = vsel %vm2249_vm5, %v2435_v41, 0 }
 0x5a0   : > { %v2050_v48 = vpop.f32.mrb[28].mxu0 }
 0x5a1   : > { %v2051_v49 = vadd.f32 %v3238_v47, %v2050_v48  ;;  %v3454_v50 = vpop.f32.mrb[29].mxu0  ;;  %v2436_v48 = vld [vmem:[%s4582_s27 + $0x4] sm:$0xf] }
 0x5a2   : > { %v2053_v51 = vpop.f32.mrb[30].mxu0  ;;  %v2437_v50 = vld [vmem:[%s4582_s27 + $0x8] sm:$0xf] }
 0x5a3   : > { %v3455_v53 = vpop.f32.mrb[31].mxu0  ;;  %v2194_v54 = vsel %vm2009_vm4, %v2051_v49, -inf }
 0x5a4   : > { %2195 = vmax.xlane.f32.xlu1 %v2194_v54  ;;  %v2535_v54 = vsel %vm2249_vm5, %v2437_v50, 0 }
 0x5a8   : > { %2198 = vmax.xlane.f32.xlu1 %v2197_v56  ;;  %v2142_v57 = vpop.f32.mrb[32].mxu0  ;;  %v2438_v56 = vld [vmem:[%s4582_s27 + $0xc] sm:$0xf] }
 0x5a9   : > { %v2143_v58 = vadd.f32 %v3238_v47, %v2142_v57  ;;  %v3466_v59 = vpop.f32.mrb[33].mxu0 }
 0x5aa   : > { %v2145_v60 = vpop.f32.mrb[34].mxu0 }
 0x5ab   : > { %v3467_v61 = vpop.f32.mrb[35].mxu0  ;;  %v2200_v63 = vsel %vm2009_vm4, %v2143_v58, -inf }
 0x5ac   : > { %2204 = vmax.xlane.f32.xlu1 %v2203_v62  ;;  %2201 = vmax.xlane.f32.xlu0 %v2200_v63  ;;  %v2581_v61 = vsel %vm2249_vm5, %v2438_v56, 0  ;;  %v3667_v56 = vld [vmem:[%s4080_s8 + $0x8] sm:$0xff]  }
 0x631   : > { %v2196_v0 = vpop.xlane.xlu1 %2195 }
 0x632   : > { %v2206_v1 = vsub.f32 %v2051_v49, %v2196_v0  ;;  %v2489_v49 = vsel %vm2249_vm5, %v2436_v48, 0 }
 0x634   : > { %v2210_v2 = vmul.f32 1.442695, %v2206_v1 }
 0x635   : > { %v2199_v3 = vpop.xlane.xlu1 %2198 }
 0x636   : > { %3676 = vpow2.f32 %v2210_v2  ;;  %v2207_v4 = vsub.f32 %v2097_v52, %v2199_v3 }
 0x638   : > { %v2212_v5 = vmul.f32 1.442695, %v2207_v4 }
 0x639   : > { %v2205_v6 = vpop.xlane.xlu1 %2204  ;;  %v2202_v7 = vpop.xlane.xlu0 %2201 }
 0x63a   : > { %3678 = vpow2.f32 %v2212_v5  ;;  %v2209_v8 = vsub.f32 %v2189_v55, %v2205_v6  ;;  %v2208_v9 = vsub.f32 %v2143_v58, %v2202_v7 }
 0x63c   : > { %v2216_v10 = vmul.f32 1.442695, %v2209_v8  ;;  %v2214_v12 = vmul.f32 1.442695, %v2208_v9 }
 0x63e   : > { %3680 = vpow2.f32 %v2216_v10 }
 0x63f   : > { %3682 = vpow2.f32 %v2214_v12 }
 0x640   : > { %v3677_v13 = vpop.eup %3676 }
 0x641   : > { %v2218_v14 = vsel %vm2009_vm4, %v3677_v13, 0.0 }
 0x642   : > { %2219 = vadd.xlane.f32.xlu0 %v2218_v14 }
 0x644   : > { %v3679_v16 = vpop.eup %3678 }
 0x645   : > { %v2221_v17 = vsel %vm2009_vm4, %v3679_v16, 0.0 }
 0x646   : > { %2222 = vadd.xlane.f32.xlu1 %v2221_v17 }
 0x648   : > { %v3681_v18 = vpop.eup %3680 }
 0x649   : > { %v3683_v19 = vpop.eup %3682  ;;  %v2227_v20 = vsel %vm2009_vm4, %v3681_v18, 0.0 }
 0x64a   : > { %2228 = vadd.xlane.f32.xlu1 %v2227_v20  ;;  %v2224_v15 = vsel %vm2009_vm4, %v3683_v19, 0.0 }
 0x64b   : > { %2225 = vadd.xlane.f32.xlu0 %v2224_v15 }
 0x6cf   : > { %v2220_v21 = vpop.xlane.xlu0 %2219 }
 0x6d0   : > { %3684 = vrcp.f32 %v2220_v21 }
 0x6d3   : > { %v2223_v22 = vpop.xlane.xlu1 %2222 }
 0x6d4   : > { %3686 = vrcp.f32 %v2223_v22 }
 0x6d7   : > { %v2229_v25 = vpop.xlane.xlu1 %2228 }
 0x6d8   : > { %3688 = vrcp.f32 %v2229_v25  ;;  %v2226_v27 = vpop.xlane.xlu0 %2225 }
 0x6d9   : > { %3690 = vrcp.f32 %v2226_v27 }
 0x6da   : > { %v3685_v28 = vpop.eup %3684 }
 0x6db   : > { %v2234_v31 = vmul.f32 %v3685_v28, %v3677_v13 }
 0x6dd   : > { %v2238_v32 = vpack.c.bf16 %v2234_v31, %v2234_v31 }
 0x6de   : > { %v3687_v34 = vpop.eup %3686 }
 0x6df   : > { %v2235_v38 = vmul.f32 %v3687_v34, %v3679_v16  ;;  %3477 = vmatmul.mubr.msk.bf16.vlgmr.msra.gmra.mrb[36].mxu0 %vm2009_vm4, %v2238_v32 }
 0x6e0   : > { %3487 = vmatpush3.bf16.msra.mxu0 %v2343_v36  ;;  %3488 = vmatprep.mubr.msk.bf16.mxu0 %vm3798_vm3, %v3797_v46 }
 0x6e1   : > { %v2239_v33 = vpack.c.bf16 %v2235_v38, %v2235_v38  ;;  %3498 = vmatprep.subr.bf16.mxu0 %v3797_v46 }
 0x6e2   : > { %v3689_v39 = vpop.eup %3688 }
 0x6e3   : > { %v3691_v11 = vpop.eup %3690  ;;  %3483 = vmatmul.mubr.msk.bf16.vlgmr.msra.gmra.mrb[28].mxu1 %vm2009_vm4, %v2239_v33  ;;  %v2237_v43 = vmul.f32 %v3689_v39, %v3681_v18 }
 0x6e4   : > { %v2236_v42 = vmul.f32 %v3691_v11, %v3683_v19  ;;  %3493 = vmatpush3.bf16.msra.mxu1 %v2389_v40  ;;  %3494 = vmatprep.mubr.msk.bf16.mxu1 %vm3798_vm3, %v3797_v46 }
 0x6e5   : > { %3504 = vmatprep.subr.bf16.mxu1 %v3797_v46  ;;  %v2241_v47 = vpack.c.bf16 %v2237_v43, %v2237_v43  ;;  %v3664_v43 = vld [vmem:[%s4071_s13] sm:$0xff]  }
 0x6e6   : > { %v2240_v44 = vpack.c.bf16 %v2236_v42, %v2236_v42 }
 0x6e8   : > { %3489 = vmatmul.mubr.msk.bf16.vlgmr.msra.gmra.mrb[40].mxu0 %vm2009_vm4, %v2240_v44 }
 0x6e9   : > { %3499 = vmatpush3.bf16.msra.mxu0 %v2443_v45  ;;  %3500 = vmatprep.mubr.msk.bf16.mxu0 %vm3798_vm3, %v3797_v46 }
 0x6ea   : > { %3510 = vmatprep.subr.bf16.mxu0 %v3797_v46 }
 0x6eb   : > { %3495 = vmatmul.mubr.msk.bf16.vlgmr.msra.gmra.mrb[32].mxu1 %vm2009_vm4, %v2241_v47 }
 0x6ec   : > { %3506 = vmatprep.mubr.msk.bf16.mxu1 %vm3798_vm3, %v3797_v46  ;;  %3505 = vmatpush3.bf16.msra.mxu1 %v2489_v49  ;;  %v3252_v49 = vld [vmem:[%s4585_s6] ss:$0 sm:$0xff] }
 0x6ed   : > { %3516 = vmatprep.subr.bf16.mxu1 %v3797_v46 }
 0x7b2   : > { %v2287_v51 = vpop.f32.mrb[36].mxu0 }
 0x7b3   : > { %v2431_v52 = vpack.c.bf16 %v2287_v51, %v2287_v51  ;;  %v3478_v53 = vpop.f32.mrb[37].mxu0  ;;  %v3253_v51 = vld [vmem:[%s1000_s25] ss:$0 sm:$0xff] }
 0x7b4   : > { %v2290_v55 = vpop.f32.mrb[38].mxu0 }
 0x7b5   : > { %v3479_v57 = vpop.f32.mrb[39].mxu0  ;;  %3501 = vmatmul.mubr.msk.bf16.vlgmr.msra.gmra.mrb[44].mxu0 %vm2009_vm4, %v2431_v52  ;;  %v3666_v55 = vld [vmem:[%s4080_s8] sm:$0xff]  }
 0x7b6   : > { %v2333_v58 = vpop.f32.mrb[28].mxu1  ;;  %3511 = vmatpush3.bf16.msra.mxu0 %v2535_v54  ;;  %3512 = vmatprep.mubr.msk.bf16.mxu0 %vm3798_vm3, %v3797_v46  ;;  %v3668_v57 = vld [vmem:[%s4080_s8 + $0x10] sm:$0xff]  }
 0x7b7   : > { %v2432_v59 = vpack.c.bf16 %v2333_v58, %v2333_v58  ;;  %v3484_v60 = vpop.f32.mrb[29].mxu1  ;;  %3522 = vmatprep.subr.bf16.mxu0 %v3797_v46  ;;  %v3669_v58 = vld [vmem:[%s4080_s8 + $0x18] sm:$0xff]  }
 0x7b8   : > { %v2336_v62 = vpop.f32.mrb[30].mxu1  ;;  %v3671_v60 = vld [vmem:[%s4080_s8 + $0x28] sm:$0xff]  }
 0x7b9   : > { %v3485_v63 = vpop.f32.mrb[31].mxu1  ;;  %3507 = vmatmul.mubr.msk.bf16.vlgmr.msra.gmra.mrb[36].mxu1 %vm2009_vm4, %v2432_v59  ;;  %v3670_v59 = vld [vmem:[%s4080_s8 + $0x20] sm:$0xff]   ;;  %v3673_v62 = vld [vmem:[%s4080_s8 + $0x38] sm:$0xff]  }
 0x7ba   : > { %3517 = vmatpush3.bf16.msra.mxu1 %v2581_v61  ;;  %3518 = vmatprep.mubr.msk.bf16.mxu1 %vm3798_vm3, %v3797_v46  ;;  %v3672_v61 = vld [vmem:[%s4080_s8 + $0x30] sm:$0xff]   ;;  %v3254_v63 = vld [vmem:[%s1008_s14] ss:$0 sm:$0xff] }
 0x7bb   : > { %v2379_v0 = vpop.f32.mrb[40].mxu0  ;;  %3530 = vmatprep.subr.bf16.mxu1 %v3797_v46 }
 0x7bc   : > { %v2433_v1 = vpack.c.bf16 %v2379_v0, %v2379_v0  ;;  %v3490_v2 = vpop.f32.mrb[41].mxu0 }
 0x7bd   : > { %v2382_v3 = vpop.f32.mrb[42].mxu0 }
 0x7be   : > { %v3491_v4 = vpop.f32.mrb[43].mxu0  ;;  %3513 = vmatmul.mubr.msk.bf16.vlgmr.msra.gmra.mrb[48].mxu0 %vm2009_vm4, %v2433_v1  ;;  %v2425_v5 = vpop.f32.mrb[32].mxu1 }
 0x7bf   : > { %v2434_v6 = vpack.c.bf16 %v2425_v5, %v2425_v5  ;;  %v3496_v7 = vpop.f32.mrb[33].mxu1  ;;  %3526 = vmatprep.mubr.msk.bf16.mxu0 %vm3798_vm3, %v3797_v46  ;;  %3523 = vmatpush3.bf16.msra.mxu0 %v3664_v43 }
 0x7c0   : > { %v2428_v8 = vpop.f32.mrb[34].mxu1  ;;  %3524 = vmatprep.subr.bf16.mxu0 %v3797_v46 }
 0x7c1   : > { %v3497_v9 = vpop.f32.mrb[35].mxu1  ;;  %3519 = vmatmul.mubr.msk.bf16.vlgmr.msra.gmra.mrb[40].mxu1 %vm2009_vm4, %v2434_v6 }
 0x7c2   : > { %3546 = vmatprep.mubr.msk.bf16.mxu1 %vm3798_vm3, %v3797_v46  ;;  %3531 = vmatpush3.bf16.msra.mxu1 %v3666_v55 }
 0x7c3   : > { %3532 = vmatprep.subr.bf16.mxu1 %v3797_v46 }
 0x7c6   : > { %3533 = vmatpush3.bf16.msra.mxu1 %v3667_v56 }
 0x7c7   : > { %3534 = vmatprep.subr.bf16.mxu1 %v3797_v46 }
 0x7ca   : > { %3535 = vmatpush3.bf16.msra.mxu1 %v3668_v57 }
 0x7cb   : > { %3536 = vmatprep.subr.bf16.mxu1 %v3797_v46 }
 0x7ce   : > { %3537 = vmatpush3.bf16.msra.mxu1 %v3669_v58 }
 0x7cf   : > { %3538 = vmatprep.subr.bf16.mxu1 %v3797_v46 }
 0x7d2   : > { %3539 = vmatpush3.bf16.msra.mxu1 %v3670_v59 }
 0x7d3   : > { %3540 = vmatprep.subr.bf16.mxu1 %v3797_v46 }
 0x7d6   : > { %3541 = vmatpush3.bf16.msra.mxu1 %v3671_v60 }
 0x7d7   : > { %3542 = vmatprep.subr.bf16.mxu1 %v3797_v46 }
 0x7da   : > { %3543 = vmatpush3.bf16.msra.mxu1 %v3672_v61 }
 0x7db   : > { %3544 = vmatprep.subr.bf16.mxu1 %v3797_v46 }
 0x7de   : > { %3545 = vmatpush3.bf16.msra.mxu1 %v3673_v62 }
 0x888   : > { %v2479_v10 = vpop.f32.mrb[44].mxu0 }
 0x889   : > { %v3502_v12 = vpop.f32.mrb[45].mxu0  ;;  %v2623_v17 = vsel %vm1205_vm2, %v2479_v10, 0.0 }
 0x88a   : > { %v2482_v13 = vpop.f32.mrb[46].mxu0 }
 0x88b   : > { %v3503_v14 = vpop.f32.mrb[47].mxu0  ;;  %v3267_v13 = vld [vmem:[%s1016_s16] ss:$0 sm:$0xff] }
 0x88c   : > { %v2525_v16 = vpop.f32.mrb[36].mxu1 }
 0x88d   : > { %v2624_v18 = vsel %vm1205_vm2, %v2525_v16, 0.0  ;;  %v3508_v19 = vpop.f32.mrb[37].mxu1 }
 0x88e   : > { %v2625_v20 = vadd.f32 %v2624_v18, %v2623_v17  ;;  %v2528_v15 = vpop.f32.mrb[38].mxu1 }
 0x88f   : > { %v3509_v21 = vpop.f32.mrb[39].mxu1 }
 0x891   : > { %v2571_v22 = vpop.f32.mrb[48].mxu0 }
 0x892   : > { %v2626_v23 = vsel %vm1205_vm2, %v2571_v22, 0.0  ;;  %v3514_v24 = vpop.f32.mrb[49].mxu0 }
 0x893   : > { %v2627_v25 = vadd.f32 %v2626_v23, %v2625_v20  ;;  %v2574_v26 = vpop.f32.mrb[50].mxu0 }
 0x894   : > { %v3515_v27 = vpop.f32.mrb[51].mxu0  ;;  %v2617_v28 = vpop.f32.mrb[40].mxu1 }
 0x895   : > { %v2628_v29 = vsel %vm1205_vm2, %v2617_v28, 0.0  ;;  %v3520_v30 = vpop.f32.mrb[41].mxu1 }
 0x896   : > { %v2629_v31 = vadd.f32 %v2628_v29, %v2627_v25  ;;  %v2620_v32 = vpop.f32.mrb[42].mxu1  ;;  %v3269_v29 = vld [vmem:[%s4588_s24] ss:$0 sm:$0xff] (!%p3268_p1) }
 0x897   : > { %v3521_v34 = vpop.f32.mrb[43].mxu1 }
 0x898   : > { %v2630_v36 = vadd.f32 %v2629_v31, %v4137_v37  ;;  %v3665_v37 = vld [vmem:[%s4071_s13 + $0x8] sm:$0xff]   ;;  %v3270_v31 = vld [vmem:[%s4589_s29] ss:$0 sm:$0xff] (!%p3268_p1) }
 0x899   : > { %3525 = vmatpush3.bf16.msra.mxu0 %v3665_v37 }
 0x89a   : > { %v4363_v38 = vadd.f32 %v3251_v35, %v2630_v36 }
 0x89c   : > { %v2641_v33 = vsel %vm1205_vm2, %v4363_v38, 0.0 }
 0x89d   : > { %2642 = vadd.xlane.f32.xlu0 %v2641_v33 }
 0x92a   : > { %v2643_v39 = vpop.xlane.xlu0 %2642 }
 0x92b   : > { %v2644_v11 = vmul.f32 0.03125, %v2643_v39 }
 0x92d   : > { %v2645_v40 = vsub.f32 %v4363_v38, %v2644_v11 }
 0x92f   : > { %v2646_v41 = vmul.f32 %v2645_v40, %v2645_v40 }
 0x931   : > { %v2647_v42 = vsel %vm1205_vm2, %v2646_v41, 0.0 }
 0x932   : > { %2648 = vadd.xlane.f32.xlu1 %v2647_v42 }
 0x9bf   : > { %v2649_v44 = vpop.xlane.xlu1 %2648 }
 0x9c0   : > { %v2650_v45 = vmul.f32 0.03125, %v2649_v44 }
 0x9c2   : > { %v2651_v47 = vadd.f32 1e-05, %v2650_v45 }
 0x9c4   : > { %3692 = vrsqrt.f32 %v2651_v47 }
 0x9ce   : > { %v3693_v48 = vpop.eup %3692 }
 0x9cf   : > { %v2653_v50 = vmul.f32 %v3693_v48, %v2645_v40 }
 0x9d1   : > { %v2660_v52 = vmul.f32 %v3252_v49, %v2653_v50 }
 0x9d3   : > { %v2667_v53 = vadd.f32 %v3253_v51, %v2660_v52 }
 0x9d5   : > { %v2668_v54 = vpack.c.bf16 %v2667_v53, %v2667_v53 }
 0x9d7   : > { %3527 = vmatmul.mubr.msk.bf16.vlgmr.msra.gmra.mrb[52].mxu0 %vm1205_vm2, %v2668_v54 }
 0xaaa   : > { %v2729_v0 = vpop.f32.mrb[52].mxu0 }
 0xaab   : > { %v2730_v1 = vadd.f32 %v3254_v63, %v2729_v0  ;;  %v3528_v2 = vpop.f32.mrb[53].mxu0 }
 0xaac   : > { %v2732_v3 = vpop.f32.mrb[54].mxu0 }
 0xaad   : > { %v3258_v4 = vmul.f32 -1.702, %v2730_v1  ;;  %v3529_v5 = vpop.f32.mrb[55].mxu0 }
 0xaaf   : > { %v2737_v6 = vmul.f32 1.442695, %v3258_v4 }
 0xab1   : > { %3694 = vpow2.f32 %v2737_v6 }
 0xabb   : > { %v3695_v7 = vpop.eup %3694 }
 0xabc   : > { %v2739_v8 = vadd.f32 1.0, %v3695_v7 }
 0xabe   : > { %3696 = vrcp.f32 %v2739_v8 }
 0xac8   : > { %v3697_v46 = vpop.eup %3696 }
 0xac9   : > { %v2742_v9 = vmul.f32 %v3697_v46, %v2730_v1 }
 0xacb   : > { %v2743_v10 = vpack.c.bf16 %v2742_v9, %v2742_v9 }
 0xacd   : > { %3547 = vmatmul.mubr.bf16.vlgmr.msra.gmra.mrb[44].mxu1 %v2743_v10 }
 0xb9f   : > { %2861 = sbr.rel (%p3268_p1) target bundleno = 3295 (0xcdf), region = 124 }
 0xba0   : > { %v2842_v12 = vpop.f32.mrb[44].mxu1 }
 0xba1   : > { %v2848_v14 = vadd.f32 %v2842_v12, %v4363_v38  ;;  %v3548_v16 = vpop.f32.mrb[45].mxu1 }
 0xba2   : > { %v2845_v17 = vpop.f32.mrb[46].mxu1 }
 0xba3   : > { %v2856_v18 = vadd.f32 %v3267_v13, %v2848_v14  ;;  %v3549_v19 = vpop.f32.mrb[47].mxu1 }
 0xba5   : > { %2857 = vst.msk [vmem:[#allocation2] sm:$0xff] %vm1205_vm2, %v2856_v18  ;;  %v2864_v20 = vsel (!%p3268_p1), %vm1205_vm2, %v2856_v18, 0.0 }
 0xba6   : > { %2865 = vadd.xlane.f32.xlu0 %v2864_v20 }
 0xc33   : > { %v2866_v15 = vpop.xlane.xlu0 %2865 }
 0xc34   : > { %v2867_v21 = vmul.f32 0.03125, %v2866_v15 }
 0xc36   : > { %v2868_v22 = vsub.f32 %v2856_v18, %v2867_v21 }
 0xc38   : > { %v2869_v23 = vmul.f32 %v2868_v22, %v2868_v22 }
 0xc3a   : > { %v2870_v24 = vsel %vm1205_vm2, %v2869_v23, 0.0 }
 0xc3b   : > { %2871 = vadd.xlane.f32.xlu0 %v2870_v24 }
 0xcc8   : > { %v2872_v25 = vpop.xlane.xlu0 %2871 }
 0xcc9   : > { %v2873_v26 = vmul.f32 0.03125, %v2872_v25 }
 0xccb   : > { %v2874_v27 = vadd.f32 1e-05, %v2873_v26 }
 0xccd   : > { %3698 = vrsqrt.f32 %v2874_v27 }
 0xcd7   : > { %v3699_v28 = vpop.eup %3698 }
 0xcd8   : > { %v2876_v30 = vmul.f32 %v3699_v28, %v2868_v22 }
 0xcda   : > { %v2883_v32 = vmul.f32 %v3269_v29, %v2876_v30 }
 0xcdc   : > { %v2890_v34 = vadd.f32 %v3270_v31, %v2883_v32 }
 0xcde   : > { %2891 = vst.msk [vmem:[%s948_s12] sm:$0xff] %vm1205_vm2, %v2890_v34 }
 0xcdf PF: > { %s4590_s30 = sld [smem:[#allocation10_spill]]  ;;  %s4591_s28 = sld [smem:[#allocation7_spill]] }
 0xce0   : > { %s4593_s21 = sld [smem:[#allocation41_spill]]  ;;  %s2906_s10 = sshll.u32 %s948_s12, 4  ;;  %s2907_s10 = int_to_ptr.vmem [resolvable:$true] %s2906_s10 }
 0xce1   : > { %s3700_s1 = scalar_lea.vmem %s2907_s10, 128  ;;  %s3799_s13 = smov [#allocation3]  }
 0xce2   : > { %p3701_p2 = scmp.ne.s32.totalorder %s2907_s10, %s3700_s1  ;;  %s3704_s25 = sshll.u32 %s3799_s13, 4  ;;  %s3705_s25 = int_to_ptr.vmem [resolvable:$false] %s3704_s25 }
 0xce3   : > { %s3706_s8 = scalar_lea.vmem %s3705_s25, 256  ;;  %p3707_p6 = scmp.lt.s32.totalorder %s2907_s10, %s3705_s25 }
 0xce4   : > { %p3702_p4 = pnand %p3701_p2, %p3974_p3  ;;  %p3708_p7 = scmp.lt.s32.totalorder %s3706_s8, %s3700_s1 }
 0xce5   : > { %s3272_s23 = sshll.u32 %s4590_s30, 7  ;;  %s4594_s6 = sand.u32 1, %s4591_s28  }
 0xce6   : > { %s4426_s0 = scalar_lea.hbm %s4593_s21, %s3272_s23  ;;  %s2893_s11 = scalar_lea.sflag [#allocation4], %s4594_s6 }
 0xce7   : > { %p3703_p5 = pneg %p3702_p4  ;;  %p3709_p8 = por %p3708_p7, %p3707_p6 }
 0xce9   : > { %p3710_p10 = pnand %p3709_p8, %p3703_p5 }
 0xceb   : > { %3713 = shalt.err (!%p3710_p10)
}
 0xcec   : > { %s3714_s2 = scalar_lea.hbm %s4426_s0, 128  ;;  %s3718_s14 = scalar_lea.hbm %s4593_s21, 256 }
 0xced   : > { %p3715_p11 = scmp.ne.s32.totalorder %s4426_s0, %s3714_s2  ;;  %p3719_p0 = scmp.lt.u32.totalorder %s4426_s0, %s4593_s21 }
 0xcee   : > { %p3720_p1 = scmp.lt.u32.totalorder %s3718_s14, %s3714_s2  ;;  %p3722_p4 = scmp.lt.u32.totalorder %s3714_s2, %s4426_s0 }
 0xcef   : > { %p3716_p12 = pnand %p3715_p11, %p3974_p3 }
 0xcf0   : > { %p3721_p2 = por %p3720_p1, %p3719_p0 }
 0xcf1   : > { %p3717_p13 = pneg %p3716_p12 }
 0xcf2   : > { %p3723_p5 = por %p3722_p4, %p3721_p2 }
 0xcf4   : > { %p3724_p6 = pnand %p3723_p5, %p3717_p13 }
 0xcf6   : > { %3727 = shalt.err (!%p3724_p6)
}
 0xcf7   : > { %3550 = dma.vmem_to_hbm [thread:$0]  (%p3974_p3), %s2907_s10, 128, %s4426_s0, %s2893_s11  }
 0xcf8 PF: > { %s4595_s5 = sld [smem:[#allocation13_spill]]  ;;  %s4596_s24 = sld [smem:[#allocation6_spill]] }
 0xcfe   : > { %p3556_p7 = scmp.ge.s32.totalorder %s4595_s5, 2  ;;  %s2918_s4 = sand.u32 1, %s4596_s24  }
 0xcff   : > { %s2919_s29 = scalar_lea.sflag [#allocation4], %s2918_s4 }
 0xd00   : > { %p3553_p8 = pnand %p3556_p7, %p3984_p9 }
 0xd02   : > { %3761 = dma.done.wait (!%p3553_p8), %s2919_s29, 128  }
 0xd03   : > { %3763 = vsyncadd (!%p3553_p8), %s2919_s29, 4294967168  ;;  %s37_s0 = sadd.s32 1, %s4595_s5   ;;  %s4598_s5 = sld [smem:[#allocation7_spill]] }
 0xd04   : > { %p34_p10 = scmp.ge.s32.totalorder %s37_s0, 6   ;;  %s4599_s26 = sld [smem:[#allocation8_spill]] }
 0xd05   : > { %s4600_s27 = sld [smem:[#allocation18_spill]]  ;;  %s4601_s28 = sld [smem:[#allocation11_spill]] }
 0xd06   : > { %s4602_s6 = sld [smem:[#allocation12_spill]]  ;;  %s4603_s2 = sld [smem:[#allocation14_spill]] }
 0xd07   : > { %s4604_s29 = sld [smem:[#allocation16_spill]]  ;;  %36 = sbr.rel (!%p34_p10) target bundleno = 27 (0x1b), region = 207 }
 0xd0e   :  { %2924 = vsyncpa [#allocation4], 1 }
 0xd0f   :  { %2926 = vsyncpa [#allocation4 + $0x1], 1 }

</bundles_post_ra>
